<compile_context>
chip_gen: v7x
topology: tpu7x:2x2x1
jax: 0.10.0
libtpu: 0.0.40
codegen_flags: <defaults>
</compile_context>

<pallas_src>
import functools

import jax
import jax.numpy as jnp
from jax.experimental import pallas as pl
from jax.experimental.pallas import tpu as pltpu


def _round_up(v, m):
    return (v + m - 1) // m * m


def _freq_attn_kernel(x_ref, wqkv_ref, bqkv_ref, wp_ref, bp_ref, o_ref,
                      qkv_scr, yacc_scr, *, num_heads, dim):
    """One grid step = Bb batch elements.

    Fused QKV projection -> one wide bf16 cast staged in VMEM -> per-head
    (Bb-batched) attention with the output projection accumulated per head
    into a lane-dense (Bb*N, Cp) f32 accumulator -> bias + single wide store.
    """
    Bb, N, Cp = x_ref.shape
    C = dim
    hd = C // num_heads

    x = x_ref[...].reshape(Bb * N, Cp)                          # bf16 (Bb*N, Cp)

    # Fused QKV projection: one wide MXU matmul, f32 accumulation, f32 bias,
    # then ONE wide bf16 cast written lane-dense into VMEM scratch.
    qkv = jnp.dot(x, wqkv_ref[...], preferred_element_type=jnp.float32)
    qkv_scr[...] = (qkv + bqkv_ref[...]).astype(jnp.bfloat16)   # (Bb*N, QKVp)

    # Projection accumulator: scratch persists across grid steps -> re-zero.
    yacc_scr[...] = jnp.zeros_like(yacc_scr)

    # Per-head attention, batched over the Bb batch elements (static unroll).
    for h in range(num_heads):
        o0 = h * hd
        q_h = qkv_scr[:, pl.ds(o0, hd)].reshape(Bb, N, hd)
        k_h = qkv_scr[:, pl.ds(C + o0, hd)].reshape(Bb, N, hd)
        v_h = qkv_scr[:, pl.ds(2 * C + o0, hd)].reshape(Bb, N, hd)

        # Scores (softmax scale already folded into the Q weights wrapper-side).
        s = jnp.einsum('bqd,bkd->bqk', q_h, k_h,
                       preferred_element_type=jnp.float32)      # (Bb, N, N) f32
        s = s - jnp.max(s, axis=-1, keepdims=True)
        p = jnp.exp(s)
        l = jnp.sum(p, axis=-1, keepdims=True)                  # (Bb, N, 1) f32

        o_h = jnp.einsum('bqk,bkd->bqd', p.astype(jnp.bfloat16), v_h,
                         preferred_element_type=jnp.float32)    # (Bb, N, hd) f32
        # Deferred normalization on the small (N, hd) tensor; reciprocal -> EUP.
        o_h = o_h * pl.reciprocal(l, approx=True)

        # Lane-dense accumulation of the output projection: each head adds
        # o_h @ W_proj[rows o0:o0+hd, :], a full-Cp-wide store — no hd-wide
        # masked scratch writes and no concat.
        yacc_scr[...] += jnp.dot(o_h.reshape(Bb * N, hd).astype(jnp.bfloat16),
                                 wp_ref[pl.ds(o0, hd), :],
                                 preferred_element_type=jnp.float32)

    y = yacc_scr[...] + bp_ref[...]
    o_ref[...] = y.reshape(Bb, N, Cp).astype(o_ref.dtype)


def frequency_attention(x, params, num_heads, *, batch_block=None):
    """Pallas-TPU forward of FrequencyAttention.

    x: (B, N, C). params use PyTorch Linear (out, in) layout:
      w_qkv (3C, C), b_qkv (3C,), w_proj (C, C), b_proj (C,).
    """
    B, N, C = x.shape
    assert C % num_heads == 0
    hd = C // num_heads
    scale = hd ** (-0.5)

    # Lane-dense padding (last dims -> multiples of 128); sliced back at the end.
    Cp = _round_up(C, 128)
    QKVp = _round_up(3 * C, 128)

    # --- one-time wrapper-side weight prep (plain JAX; cache if jitting per-step) ---
    w_qkv = params["w_qkv"].astype(jnp.float32)     # (3C, C)
    b_qkv = params["b_qkv"].astype(jnp.float32)     # (3C,)
    # Fold the softmax scale into the Q output features (rows 0:C of w_qkv).
    row_scale = jnp.concatenate([jnp.full((C,), scale, jnp.float32),
                                 jnp.ones((2 * C,), jnp.float32)])
    w_qkv_t = jnp.zeros((Cp, QKVp), jnp.float32)
    w_qkv_t = w_qkv_t.at[:C, :3 * C].set((w_qkv * row_scale[:, None]).T)
    w_qkv_t = w_qkv_t.astype(jnp.bfloat16)                               # (Cp, QKVp)
    b_qkv_s = jnp.zeros((1, QKVp), jnp.float32).at[0, :3 * C].set(b_qkv * row_scale)
    w_p_t = jnp.zeros((C, Cp), jnp.float32)
    w_p_t = w_p_t.at[:, :C].set(params["w_proj"].astype(jnp.float32).T)
    w_p_t = w_p_t.astype(jnp.bfloat16)                                   # (C, Cp)
    b_p = jnp.zeros((1, Cp), jnp.float32).at[0, :C].set(
        params["b_proj"].astype(jnp.float32))

    x_bf = x.astype(jnp.bfloat16)
    if Cp != C:
        x_bf = jnp.pad(x_bf, ((0, 0), (0, 0), (0, Cp - C)))

    # --- VMEM budget: derive from hardware with ~25% headroom ------------------
    try:
        vmem_cap = int(pltpu.get_tpu_info().vmem_capacity_bytes)
    except Exception:  # pragma: no cover - conservative (v7x-sized) fallback
        vmem_cap = 64 * 1024 * 1024
    budget = int(vmem_cap * 0.75)

    out_itemsize = jnp.dtype(x.dtype).itemsize
    weight_bytes = (w_qkv_t.size * 2 + b_qkv_s.size * 4
                    + w_p_t.size * 2 + b_p.size * 4)       # Buffered(1): one copy

    def est_vmem(bb):
        return int(
            2 * bb * N * Cp * 2                  # x blocks (bf16, double-buffered)
            + 2 * bb * N * Cp * out_itemsize     # out blocks (double-buffered)
            + weight_bytes                       # constant weights, single-buffered
            + bb * N * QKVp * 2                  # staged qkv scratch (bf16)
            + bb * N * Cp * 4                    # projection accumulator (f32)
            + bb * N * QKVp * 4                  # live f32 qkv before the bf16 cast
            + 2 * bb * N * N * 4                 # s + p softmax intermediates
            + 4 * 1024 * 1024)                   # compiler scratch / spill headroom

    # --- batch blocking: cap Bb at B//2 so the grid has >=2 steps, then shrink
    # until the per-step VMEM estimate fits the budget. Ragged B is zero-padded.
    max_bb = 1 if B <= 1 else max(1, B // 2)
    if batch_block is not None:
        max_bb = max(1, min(max_bb, int(batch_block)))
    Bb = 1
    for cand in range(max_bb, 0, -1):
        if est_vmem(cand) <= budget:
            Bb = cand
            break
    nb = -(-B // Bb)                  # ceil-div
    Bp = nb * Bb
    if Bp != B:                       # pad B instead of shrinking Bb toward 1
        x_bf = jnp.pad(x_bf, ((0, Bp - B), (0, 0), (0, 0)))

    vmem_limit = int(min(budget, max(est_vmem(Bb), 16 * 1024 * 1024)))

    kernel = functools.partial(_freq_attn_kernel, num_heads=num_heads, dim=C)

    # Advisory cost estimate for XLA scheduling around the kernel.
    H = num_heads
    flops = (2 * Bp * N * Cp * QKVp           # fused QKV
             + 4 * Bp * N * N * C             # QK^T + PV (all heads)
             + 2 * Bp * N * C * Cp)           # output projection
    bytes_accessed = (x_bf.size * 2 + w_qkv_t.size * 2 + w_p_t.size * 2
                      + b_qkv_s.size * 4 + b_p.size * 4
                      + Bp * N * Cp * out_itemsize)
    cost = pl.CostEstimate(flops=flops, transcendentals=Bp * H * N * N,
                           bytes_accessed=bytes_accessed)

    def const_spec(shape):
        # Constant (index-invariant) blocks: single-buffered, fetched once.
        return pl.BlockSpec(shape, lambda i: tuple(0 for _ in shape),
                            pipeline_mode=pl.Buffered(1))

    out_padded = pl.pallas_call(
        kernel,
        out_shape=jax.ShapeDtypeStruct((Bp, N, Cp), x.dtype),
        grid=(nb,),
        in_specs=[
            pl.BlockSpec((Bb, N, Cp), lambda i: (i, 0, 0)),   # x, Bb batches/step
            const_spec((Cp, QKVp)),                           # fused W_qkv (bf16)
            const_spec((1, QKVp)),                            # fused b_qkv (f32)
            const_spec((C, Cp)),                              # W_proj^T (bf16)
            const_spec((1, Cp)),                              # b_proj (f32)
        ],
        out_specs=pl.BlockSpec((Bb, N, Cp), lambda i: (i, 0, 0)),
        scratch_shapes=[pltpu.VMEM((Bb * N, QKVp), jnp.bfloat16),  # staged qkv
                        pltpu.VMEM((Bb * N, Cp), jnp.float32)],    # proj accumulator
        compiler_params=pltpu.CompilerParams(
            dimension_semantics=("parallel",),
            vmem_limit_bytes=vmem_limit),
        cost_estimate=cost,
    )(x_bf, w_qkv_t, b_qkv_s, w_p_t, b_p)

    if Bp != B or Cp != C:
        out_padded = out_padded[:B, :, :C]
    return out_padded


def frequency_attention_ref(x, params, num_heads):
    """Pure-JAX f32 reference reproducing the PyTorch forward exactly."""
    B, N, C = x.shape
    hd = C // num_heads
    qkv = x @ params["w_qkv"].T + params["b_qkv"]                  # (B, N, 3C)
    qkv = qkv.reshape(B, N, 3, num_heads, hd).transpose(2, 0, 3, 1, 4)
    q, k, v = qkv[0], qkv[1], qkv[2]                               # (B, H, N, hd)
    attn = (q @ jnp.swapaxes(k, -2, -1)) * (hd ** (-0.5))
    attn = jax.nn.softmax(attn, axis=-1)
    out = jnp.swapaxes(attn @ v, 1, 2).reshape(B, N, C)
    return out @ params["w_proj"].T + params["b_proj"]


if __name__ == "__main__":
    # Small shapes consistent with the module: x is (B, N, C).
    B, N, C, num_heads = 2, 8, 32, 8

    key = jax.random.PRNGKey(0)
    kx, k1, k2, k3, k4 = jax.random.split(key, 5)

    x = jax.random.normal(kx, (B, N, C), dtype=jnp.float32)

    # Deterministic synthetic parameters (PyTorch Linear layout: (out, in)).
    params = {
        "w_qkv": 0.05 * jax.random.normal(k1, (3 * C, C), dtype=jnp.float32),
        "b_qkv": 0.01 * jax.random.normal(k2, (3 * C,), dtype=jnp.float32),
        "w_proj": 0.05 * jax.random.normal(k3, (C, C), dtype=jnp.float32),
        "b_proj": 0.01 * jax.random.normal(k4, (C,), dtype=jnp.float32),
    }

    out = frequency_attention(x, params, num_heads)
    out = jax.block_until_ready(out)

    ref = frequency_attention_ref(x, params, num_heads)
    assert out.shape == (B, N, C)
    # bf16 matmul operands + approx reciprocal => compare against f32 reference
    # with a correspondingly loosened tolerance.
    assert jnp.allclose(out, ref, atol=2e-2, rtol=2e-2), "mismatch vs reference"

    print("KERNEL_OK")
</pallas_src>

<mosaic_0001>
module attributes {stable_mosaic.version = 11 : i64} {
  func.func @_freq_attn_kernel(%arg0: i32, %arg1: memref<1x8x128xbf16, #tpu.memory_space<vmem>>, %arg2: memref<128x128xbf16, #tpu.memory_space<vmem>>, %arg3: memref<1x128xf32, #tpu.memory_space<vmem>>, %arg4: memref<32x128xbf16, #tpu.memory_space<vmem>>, %arg5: memref<1x128xf32, #tpu.memory_space<vmem>>, %arg6: memref<1x8x128xf32, #tpu.memory_space<vmem>>, %arg7: memref<8x128xbf16, #tpu.memory_space<vmem>>, %arg8: memref<8x128xf32, #tpu.memory_space<vmem>>) attributes {dimension_semantics = [#tpu.dimension_semantics<parallel>], iteration_bounds = array<i64: 2>, scalar_prefetch = 0 : i64, scratch_operands = 2 : i64, tpu.core_type = #tpu.core_type<tc>, window_params = [{transform_indices = @transform_0, window_bounds = array<i64: 1, 8, 128>}, {pipeline_mode = #tpu.pipeline_mode<synchronous>, transform_indices = @transform_1, window_bounds = array<i64: 128, 128>}, {pipeline_mode = #tpu.pipeline_mode<synchronous>, transform_indices = @transform_2, window_bounds = array<i64: 1, 128>}, {pipeline_mode = #tpu.pipeline_mode<synchronous>, transform_indices = @transform_3, window_bounds = array<i64: 32, 128>}, {pipeline_mode = #tpu.pipeline_mode<synchronous>, transform_indices = @transform_4, window_bounds = array<i64: 1, 128>}, {transform_indices = @transform_5, window_bounds = array<i64: 1, 8, 128>}]} {
    %c0 = arith.constant 0 : index
    %c0_0 = arith.constant 0 : index
    %c0_1 = arith.constant 0 : index
    %0 = vector.load %arg1[%c0, %c0_0, %c0_1] : memref<1x8x128xbf16, #tpu.memory_space<vmem>>, vector<1x8x128xbf16>
    %1 = vector.shape_cast %0 : vector<1x8x128xbf16> to vector<8x128xbf16>
    %c0_2 = arith.constant 0 : index
    %c0_3 = arith.constant 0 : index
    %2 = vector.load %arg2[%c0_2, %c0_3] : memref<128x128xbf16, #tpu.memory_space<vmem>>, vector<128x128xbf16>
    %cst = arith.constant dense<0.000000e+00> : vector<8x128xf32>
    %3 = tpu.matmul %1, %2, %cst {dimension_numbers = #tpu.dot_dimension_numbers<[1], [0], [0], [1], [0, 0, 1, 1], [], []>} : vector<8x128xbf16>, vector<128x128xbf16>, vector<8x128xf32> -> vector<8x128xf32>
    %c0_4 = arith.constant 0 : index
    %c0_5 = arith.constant 0 : index
    %4 = vector.load %arg3[%c0_4, %c0_5] : memref<1x128xf32, #tpu.memory_space<vmem>>, vector<1x128xf32>
    %5 = vector.broadcast %4 : vector<1x128xf32> to vector<8x128xf32>
    %6 = arith.addf %3, %5 : vector<8x128xf32>
    %7 = arith.truncf %6 : vector<8x128xf32> to vector<8x128xbf16>
    %c0_6 = arith.constant 0 : index
    %c0_7 = arith.constant 0 : index
    %8 = vector.load %arg7[%c0_6, %c0_7] : memref<8x128xbf16, #tpu.memory_space<vmem>>, vector<8x128xbf16>
    tpu.vector_store %arg7[%c0_6, %c0_7], %7 {strides = array<i32>} : memref<8x128xbf16, #tpu.memory_space<vmem>>, vector<8x128xbf16>,
    %cst_8 = arith.constant 0.000000e+00 : f32
    %9 = vector.broadcast %cst_8 : f32 to vector<8x128xf32>
    %c0_9 = arith.constant 0 : index
    %c0_10 = arith.constant 0 : index
    %10 = vector.load %arg8[%c0_9, %c0_10] : memref<8x128xf32, #tpu.memory_space<vmem>>, vector<8x128xf32>
    tpu.vector_store %arg8[%c0_9, %c0_10], %9 {strides = array<i32>} : memref<8x128xf32, #tpu.memory_space<vmem>>, vector<8x128xf32>,
    %c0_11 = arith.constant 0 : index
    %c0_12 = arith.constant 0 : index
    %11 = vector.load %arg7[%c0_11, %c0_12] : memref<8x128xbf16, #tpu.memory_space<vmem>>, vector<8x4xbf16>
    %12 = vector.shape_cast %11 : vector<8x4xbf16> to vector<1x8x4xbf16>
    %c0_13 = arith.constant 0 : index
    %c32 = arith.constant 32 : index
    %13 = vector.load %arg7[%c0_13, %c32] : memref<8x128xbf16, #tpu.memory_space<vmem>>, vector<8x4xbf16>
    %14 = vector.shape_cast %13 : vector<8x4xbf16> to vector<1x8x4xbf16>
    %c0_14 = arith.constant 0 : index
    %c64 = arith.constant 64 : index
    %15 = vector.load %arg7[%c0_14, %c64] : memref<8x128xbf16, #tpu.memory_space<vmem>>, vector<8x4xbf16>
    %16 = vector.shape_cast %15 : vector<8x4xbf16> to vector<1x8x4xbf16>
    "tpu.trace_start"() <{level = 10 : i32, message = "bqd,bkd->bqk"}> : () -> ()
    %cst_15 = arith.constant dense<0.000000e+00> : vector<1x8x8xf32>
    %17 = tpu.matmul %12, %14, %cst_15 {dimension_numbers = #tpu.dot_dimension_numbers<[2], [2], [1], [1], [0, 0, 0, 1, 1, 1], [0], [0]>} : vector<1x8x4xbf16>, vector<1x8x4xbf16>, vector<1x8x8xf32> -> vector<1x8x8xf32>
    "tpu.trace_stop"() : () -> ()
    %cst_16 = arith.constant dense<0xFF800000> : vector<1x8xf32>
    %18 = vector.multi_reduction <maximumf>, %17, %cst_16 [2] : vector<1x8x8xf32> to vector<1x8xf32>
    %19 = vector.shape_cast %18 : vector<1x8xf32> to vector<1x8x1xf32>
    %20 = vector.broadcast %19 : vector<1x8x1xf32> to vector<1x8x8xf32>
    %21 = arith.subf %17, %20 : vector<1x8x8xf32>
    %22 = math.exp %21 : vector<1x8x8xf32>
    %cst_17 = arith.constant dense<0.000000e+00> : vector<1x8xf32>
    %23 = vector.multi_reduction <add>, %22, %cst_17 [2] : vector<1x8x8xf32> to vector<1x8xf32>
    %24 = vector.shape_cast %23 : vector<1x8xf32> to vector<1x8x1xf32>
    %25 = arith.truncf %22 : vector<1x8x8xf32> to vector<1x8x8xbf16>
    "tpu.trace_start"() <{level = 10 : i32, message = "bqk,bkd->bqd"}> : () -> ()
    %cst_18 = arith.constant dense<0.000000e+00> : vector<1x8x4xf32>
    %26 = tpu.matmul %25, %16, %cst_18 {dimension_numbers = #tpu.dot_dimension_numbers<[2], [1], [1], [2], [0, 0, 0, 1, 1, 2], [0], [0]>} : vector<1x8x8xbf16>, vector<1x8x4xbf16>, vector<1x8x4xf32> -> vector<1x8x4xf32>
    "tpu.trace_stop"() : () -> ()
    %27 = tpu.reciprocal %24 {approx = true} : vector<1x8x1xf32> -> vector<1x8x1xf32>
    %28 = vector.broadcast %27 : vector<1x8x1xf32> to vector<1x8x4xf32>
    %29 = arith.mulf %26, %28 : vector<1x8x4xf32>
    %c0_19 = arith.constant 0 : index
    %c0_20 = arith.constant 0 : index
    %30 = vector.load %arg8[%c0_19, %c0_20] : memref<8x128xf32, #tpu.memory_space<vmem>>, vector<8x128xf32>
    %31 = vector.shape_cast %29 : vector<1x8x4xf32> to vector<8x4xf32>
    %32 = arith.truncf %31 : vector<8x4xf32> to vector<8x4xbf16>
    %c0_21 = arith.constant 0 : index
    %c0_22 = arith.constant 0 : index
    %33 = vector.load %arg4[%c0_21, %c0_22] : memref<32x128xbf16, #tpu.memory_space<vmem>>, vector<4x128xbf16>
    %cst_23 = arith.constant dense<0.000000e+00> : vector<8x128xf32>
    %34 = tpu.matmul %32, %33, %cst_23 {dimension_numbers = #tpu.dot_dimension_numbers<[1], [0], [0], [1], [0, 0, 1, 1], [], []>} : vector<8x4xbf16>, vector<4x128xbf16>, vector<8x128xf32> -> vector<8x128xf32>
    %35 = arith.addf %30, %34 : vector<8x128xf32>
    %c0_24 = arith.constant 0 : index
    %c0_25 = arith.constant 0 : index
    %36 = vector.load %arg8[%c0_24, %c0_25] : memref<8x128xf32, #tpu.memory_space<vmem>>, vector<8x128xf32>
    tpu.vector_store %arg8[%c0_24, %c0_25], %35 {strides = array<i32>} : memref<8x128xf32, #tpu.memory_space<vmem>>, vector<8x128xf32>,
    %c0_26 = arith.constant 0 : index
    %c4 = arith.constant 4 : index
    %37 = vector.load %arg7[%c0_26, %c4] : memref<8x128xbf16, #tpu.memory_space<vmem>>, vector<8x4xbf16>
    %38 = vector.shape_cast %37 : vector<8x4xbf16> to vector<1x8x4xbf16>
    %c0_27 = arith.constant 0 : index
    %c36 = arith.constant 36 : index
    %39 = vector.load %arg7[%c0_27, %c36] : memref<8x128xbf16, #tpu.memory_space<vmem>>, vector<8x4xbf16>
    %40 = vector.shape_cast %39 : vector<8x4xbf16> to vector<1x8x4xbf16>
    %c0_28 = arith.constant 0 : index
    %c68 = arith.constant 68 : index
    %41 = vector.load %arg7[%c0_28, %c68] : memref<8x128xbf16, #tpu.memory_space<vmem>>, vector<8x4xbf16>
    %42 = vector.shape_cast %41 : vector<8x4xbf16> to vector<1x8x4xbf16>
    "tpu.trace_start"() <{level = 10 : i32, message = "bqd,bkd->bqk"}> : () -> ()
    %cst_29 = arith.constant dense<0.000000e+00> : vector<1x8x8xf32>
    %43 = tpu.matmul %38, %40, %cst_29 {dimension_numbers = #tpu.dot_dimension_numbers<[2], [2], [1], [1], [0, 0, 0, 1, 1, 1], [0], [0]>} : vector<1x8x4xbf16>, vector<1x8x4xbf16>, vector<1x8x8xf32> -> vector<1x8x8xf32>
    "tpu.trace_stop"() : () -> ()
    %cst_30 = arith.constant dense<0xFF800000> : vector<1x8xf32>
    %44 = vector.multi_reduction <maximumf>, %43, %cst_30 [2] : vector<1x8x8xf32> to vector<1x8xf32>
    %45 = vector.shape_cast %44 : vector<1x8xf32> to vector<1x8x1xf32>
    %46 = vector.broadcast %45 : vector<1x8x1xf32> to vector<1x8x8xf32>
    %47 = arith.subf %43, %46 : vector<1x8x8xf32>
    %48 = math.exp %47 : vector<1x8x8xf32>
    %cst_31 = arith.constant dense<0.000000e+00> : vector<1x8xf32>
    %49 = vector.multi_reduction <add>, %48, %cst_31 [2] : vector<1x8x8xf32> to vector<1x8xf32>
    %50 = vector.shape_cast %49 : vector<1x8xf32> to vector<1x8x1xf32>
    %51 = arith.truncf %48 : vector<1x8x8xf32> to vector<1x8x8xbf16>
    "tpu.trace_start"() <{level = 10 : i32, message = "bqk,bkd->bqd"}> : () -> ()
    %cst_32 = arith.constant dense<0.000000e+00> : vector<1x8x4xf32>
    %52 = tpu.matmul %51, %42, %cst_32 {dimension_numbers = #tpu.dot_dimension_numbers<[2], [1], [1], [2], [0, 0, 0, 1, 1, 2], [0], [0]>} : vector<1x8x8xbf16>, vector<1x8x4xbf16>, vector<1x8x4xf32> -> vector<1x8x4xf32>
    "tpu.trace_stop"() : () -> ()
    %53 = tpu.reciprocal %50 {approx = true} : vector<1x8x1xf32> -> vector<1x8x1xf32>
    %54 = vector.broadcast %53 : vector<1x8x1xf32> to vector<1x8x4xf32>
    %55 = arith.mulf %52, %54 : vector<1x8x4xf32>
    %c0_33 = arith.constant 0 : index
    %c0_34 = arith.constant 0 : index
    %56 = vector.load %arg8[%c0_33, %c0_34] : memref<8x128xf32, #tpu.memory_space<vmem>>, vector<8x128xf32>
    %57 = vector.shape_cast %55 : vector<1x8x4xf32> to vector<8x4xf32>
    %58 = arith.truncf %57 : vector<8x4xf32> to vector<8x4xbf16>
    %c4_35 = arith.constant 4 : index
    %c0_36 = arith.constant 0 : index
    %59 = vector.load %arg4[%c4_35, %c0_36] : memref<32x128xbf16, #tpu.memory_space<vmem>>, vector<4x128xbf16>
    %cst_37 = arith.constant dense<0.000000e+00> : vector<8x128xf32>
    %60 = tpu.matmul %58, %59, %cst_37 {dimension_numbers = #tpu.dot_dimension_numbers<[1], [0], [0], [1], [0, 0, 1, 1], [], []>} : vector<8x4xbf16>, vector<4x128xbf16>, vector<8x128xf32> -> vector<8x128xf32>
    %61 = arith.addf %56, %60 : vector<8x128xf32>
    %c0_38 = arith.constant 0 : index
    %c0_39 = arith.constant 0 : index
    %62 = vector.load %arg8[%c0_38, %c0_39] : memref<8x128xf32, #tpu.memory_space<vmem>>, vector<8x128xf32>
    tpu.vector_store %arg8[%c0_38, %c0_39], %61 {strides = array<i32>} : memref<8x128xf32, #tpu.memory_space<vmem>>, vector<8x128xf32>,
    %c0_40 = arith.constant 0 : index
    %c8 = arith.constant 8 : index
    %63 = vector.load %arg7[%c0_40, %c8] : memref<8x128xbf16, #tpu.memory_space<vmem>>, vector<8x4xbf16>
    %64 = vector.shape_cast %63 : vector<8x4xbf16> to vector<1x8x4xbf16>
    %c0_41 = arith.constant 0 : index
    %c40 = arith.constant 40 : index
    %65 = vector.load %arg7[%c0_41, %c40] : memref<8x128xbf16, #tpu.memory_space<vmem>>, vector<8x4xbf16>
    %66 = vector.shape_cast %65 : vector<8x4xbf16> to vector<1x8x4xbf16>
    %c0_42 = arith.constant 0 : index
    %c72 = arith.constant 72 : index
    %67 = vector.load %arg7[%c0_42, %c72] : memref<8x128xbf16, #tpu.memory_space<vmem>>, vector<8x4xbf16>
    %68 = vector.shape_cast %67 : vector<8x4xbf16> to vector<1x8x4xbf16>
    "tpu.trace_start"() <{level = 10 : i32, message = "bqd,bkd->bqk"}> : () -> ()
    %cst_43 = arith.constant dense<0.000000e+00> : vector<1x8x8xf32>
    %69 = tpu.matmul %64, %66, %cst_43 {dimension_numbers = #tpu.dot_dimension_numbers<[2], [2], [1], [1], [0, 0, 0, 1, 1, 1], [0], [0]>} : vector<1x8x4xbf16>, vector<1x8x4xbf16>, vector<1x8x8xf32> -> vector<1x8x8xf32>
    "tpu.trace_stop"() : () -> ()
    %cst_44 = arith.constant dense<0xFF800000> : vector<1x8xf32>
    %70 = vector.multi_reduction <maximumf>, %69, %cst_44 [2] : vector<1x8x8xf32> to vector<1x8xf32>
    %71 = vector.shape_cast %70 : vector<1x8xf32> to vector<1x8x1xf32>
    %72 = vector.broadcast %71 : vector<1x8x1xf32> to vector<1x8x8xf32>
    %73 = arith.subf %69, %72 : vector<1x8x8xf32>
    %74 = math.exp %73 : vector<1x8x8xf32>
    %cst_45 = arith.constant dense<0.000000e+00> : vector<1x8xf32>
    %75 = vector.multi_reduction <add>, %74, %cst_45 [2] : vector<1x8x8xf32> to vector<1x8xf32>
    %76 = vector.shape_cast %75 : vector<1x8xf32> to vector<1x8x1xf32>
    %77 = arith.truncf %74 : vector<1x8x8xf32> to vector<1x8x8xbf16>
    "tpu.trace_start"() <{level = 10 : i32, message = "bqk,bkd->bqd"}> : () -> ()
    %cst_46 = arith.constant dense<0.000000e+00> : vector<1x8x4xf32>
    %78 = tpu.matmul %77, %68, %cst_46 {dimension_numbers = #tpu.dot_dimension_numbers<[2], [1], [1], [2], [0, 0, 0, 1, 1, 2], [0], [0]>} : vector<1x8x8xbf16>, vector<1x8x4xbf16>, vector<1x8x4xf32> -> vector<1x8x4xf32>
    "tpu.trace_stop"() : () -> ()
    %79 = tpu.reciprocal %76 {approx = true} : vector<1x8x1xf32> -> vector<1x8x1xf32>
    %80 = vector.broadcast %79 : vector<1x8x1xf32> to vector<1x8x4xf32>
    %81 = arith.mulf %78, %80 : vector<1x8x4xf32>
    %c0_47 = arith.constant 0 : index
    %c0_48 = arith.constant 0 : index
    %82 = vector.load %arg8[%c0_47, %c0_48] : memref<8x128xf32, #tpu.memory_space<vmem>>, vector<8x128xf32>
    %83 = vector.shape_cast %81 : vector<1x8x4xf32> to vector<8x4xf32>
    %84 = arith.truncf %83 : vector<8x4xf32> to vector<8x4xbf16>
    %c8_49 = arith.constant 8 : index
    %c0_50 = arith.constant 0 : index
    %85 = vector.load %arg4[%c8_49, %c0_50] : memref<32x128xbf16, #tpu.memory_space<vmem>>, vector<4x128xbf16>
    %cst_51 = arith.constant dense<0.000000e+00> : vector<8x128xf32>
    %86 = tpu.matmul %84, %85, %cst_51 {dimension_numbers = #tpu.dot_dimension_numbers<[1], [0], [0], [1], [0, 0, 1, 1], [], []>} : vector<8x4xbf16>, vector<4x128xbf16>, vector<8x128xf32> -> vector<8x128xf32>
    %87 = arith.addf %82, %86 : vector<8x128xf32>
    %c0_52 = arith.constant 0 : index
    %c0_53 = arith.constant 0 : index
    %88 = vector.load %arg8[%c0_52, %c0_53] : memref<8x128xf32, #tpu.memory_space<vmem>>, vector<8x128xf32>
    tpu.vector_store %arg8[%c0_52, %c0_53], %87 {strides = array<i32>} : memref<8x128xf32, #tpu.memory_space<vmem>>, vector<8x128xf32>,
    %c0_54 = arith.constant 0 : index
    %c12 = arith.constant 12 : index
    %89 = vector.load %arg7[%c0_54, %c12] : memref<8x128xbf16, #tpu.memory_space<vmem>>, vector<8x4xbf16>
    %90 = vector.shape_cast %89 : vector<8x4xbf16> to vector<1x8x4xbf16>
    %c0_55 = arith.constant 0 : index
    %c44 = arith.constant 44 : index
    %91 = vector.load %arg7[%c0_55, %c44] : memref<8x128xbf16, #tpu.memory_space<vmem>>, vector<8x4xbf16>
    %92 = vector.shape_cast %91 : vector<8x4xbf16> to vector<1x8x4xbf16>
    %c0_56 = arith.constant 0 : index
    %c76 = arith.constant 76 : index
    %93 = vector.load %arg7[%c0_56, %c76] : memref<8x128xbf16, #tpu.memory_space<vmem>>, vector<8x4xbf16>
    %94 = vector.shape_cast %93 : vector<8x4xbf16> to vector<1x8x4xbf16>
    "tpu.trace_start"() <{level = 10 : i32, message = "bqd,bkd->bqk"}> : () -> ()
    %cst_57 = arith.constant dense<0.000000e+00> : vector<1x8x8xf32>
    %95 = tpu.matmul %90, %92, %cst_57 {dimension_numbers = #tpu.dot_dimension_numbers<[2], [2], [1], [1], [0, 0, 0, 1, 1, 1], [0], [0]>} : vector<1x8x4xbf16>, vector<1x8x4xbf16>, vector<1x8x8xf32> -> vector<1x8x8xf32>
    "tpu.trace_stop"() : () -> ()
    %cst_58 = arith.constant dense<0xFF800000> : vector<1x8xf32>
    %96 = vector.multi_reduction <maximumf>, %95, %cst_58 [2] : vector<1x8x8xf32> to vector<1x8xf32>
    %97 = vector.shape_cast %96 : vector<1x8xf32> to vector<1x8x1xf32>
    %98 = vector.broadcast %97 : vector<1x8x1xf32> to vector<1x8x8xf32>
    %99 = arith.subf %95, %98 : vector<1x8x8xf32>
    %100 = math.exp %99 : vector<1x8x8xf32>
    %cst_59 = arith.constant dense<0.000000e+00> : vector<1x8xf32>
    %101 = vector.multi_reduction <add>, %100, %cst_59 [2] : vector<1x8x8xf32> to vector<1x8xf32>
    %102 = vector.shape_cast %101 : vector<1x8xf32> to vector<1x8x1xf32>
    %103 = arith.truncf %100 : vector<1x8x8xf32> to vector<1x8x8xbf16>
    "tpu.trace_start"() <{level = 10 : i32, message = "bqk,bkd->bqd"}> : () -> ()
    %cst_60 = arith.constant dense<0.000000e+00> : vector<1x8x4xf32>
    %104 = tpu.matmul %103, %94, %cst_60 {dimension_numbers = #tpu.dot_dimension_numbers<[2], [1], [1], [2], [0, 0, 0, 1, 1, 2], [0], [0]>} : vector<1x8x8xbf16>, vector<1x8x4xbf16>, vector<1x8x4xf32> -> vector<1x8x4xf32>
    "tpu.trace_stop"() : () -> ()
    %105 = tpu.reciprocal %102 {approx = true} : vector<1x8x1xf32> -> vector<1x8x1xf32>
    %106 = vector.broadcast %105 : vector<1x8x1xf32> to vector<1x8x4xf32>
    %107 = arith.mulf %104, %106 : vector<1x8x4xf32>
    %c0_61 = arith.constant 0 : index
    %c0_62 = arith.constant 0 : index
    %108 = vector.load %arg8[%c0_61, %c0_62] : memref<8x128xf32, #tpu.memory_space<vmem>>, vector<8x128xf32>
    %109 = vector.shape_cast %107 : vector<1x8x4xf32> to vector<8x4xf32>
    %110 = arith.truncf %109 : vector<8x4xf32> to vector<8x4xbf16>
    %c12_63 = arith.constant 12 : index
    %c0_64 = arith.constant 0 : index
    %111 = vector.load %arg4[%c12_63, %c0_64] : memref<32x128xbf16, #tpu.memory_space<vmem>>, vector<4x128xbf16>
    %cst_65 = arith.constant dense<0.000000e+00> : vector<8x128xf32>
    %112 = tpu.matmul %110, %111, %cst_65 {dimension_numbers = #tpu.dot_dimension_numbers<[1], [0], [0], [1], [0, 0, 1, 1], [], []>} : vector<8x4xbf16>, vector<4x128xbf16>, vector<8x128xf32> -> vector<8x128xf32>
    %113 = arith.addf %108, %112 : vector<8x128xf32>
    %c0_66 = arith.constant 0 : index
    %c0_67 = arith.constant 0 : index
    %114 = vector.load %arg8[%c0_66, %c0_67] : memref<8x128xf32, #tpu.memory_space<vmem>>, vector<8x128xf32>
    tpu.vector_store %arg8[%c0_66, %c0_67], %113 {strides = array<i32>} : memref<8x128xf32, #tpu.memory_space<vmem>>, vector<8x128xf32>,
    %c0_68 = arith.constant 0 : index
    %c16 = arith.constant 16 : index
    %115 = vector.load %arg7[%c0_68, %c16] : memref<8x128xbf16, #tpu.memory_space<vmem>>, vector<8x4xbf16>
    %116 = vector.shape_cast %115 : vector<8x4xbf16> to vector<1x8x4xbf16>
    %c0_69 = arith.constant 0 : index
    %c48 = arith.constant 48 : index
    %117 = vector.load %arg7[%c0_69, %c48] : memref<8x128xbf16, #tpu.memory_space<vmem>>, vector<8x4xbf16>
    %118 = vector.shape_cast %117 : vector<8x4xbf16> to vector<1x8x4xbf16>
    %c0_70 = arith.constant 0 : index
    %c80 = arith.constant 80 : index
    %119 = vector.load %arg7[%c0_70, %c80] : memref<8x128xbf16, #tpu.memory_space<vmem>>, vector<8x4xbf16>
    %120 = vector.shape_cast %119 : vector<8x4xbf16> to vector<1x8x4xbf16>
    "tpu.trace_start"() <{level = 10 : i32, message = "bqd,bkd->bqk"}> : () -> ()
    %cst_71 = arith.constant dense<0.000000e+00> : vector<1x8x8xf32>
    %121 = tpu.matmul %116, %118, %cst_71 {dimension_numbers = #tpu.dot_dimension_numbers<[2], [2], [1], [1], [0, 0, 0, 1, 1, 1], [0], [0]>} : vector<1x8x4xbf16>, vector<1x8x4xbf16>, vector<1x8x8xf32> -> vector<1x8x8xf32>
    "tpu.trace_stop"() : () -> ()
    %cst_72 = arith.constant dense<0xFF800000> : vector<1x8xf32>
    %122 = vector.multi_reduction <maximumf>, %121, %cst_72 [2] : vector<1x8x8xf32> to vector<1x8xf32>
    %123 = vector.shape_cast %122 : vector<1x8xf32> to vector<1x8x1xf32>
    %124 = vector.broadcast %123 : vector<1x8x1xf32> to vector<1x8x8xf32>
    %125 = arith.subf %121, %124 : vector<1x8x8xf32>
    %126 = math.exp %125 : vector<1x8x8xf32>
    %cst_73 = arith.constant dense<0.000000e+00> : vector<1x8xf32>
    %127 = vector.multi_reduction <add>, %126, %cst_73 [2] : vector<1x8x8xf32> to vector<1x8xf32>
    %128 = vector.shape_cast %127 : vector<1x8xf32> to vector<1x8x1xf32>
    %129 = arith.truncf %126 : vector<1x8x8xf32> to vector<1x8x8xbf16>
    "tpu.trace_start"() <{level = 10 : i32, message = "bqk,bkd->bqd"}> : () -> ()
    %cst_74 = arith.constant dense<0.000000e+00> : vector<1x8x4xf32>
    %130 = tpu.matmul %129, %120, %cst_74 {dimension_numbers = #tpu.dot_dimension_numbers<[2], [1], [1], [2], [0, 0, 0, 1, 1, 2], [0], [0]>} : vector<1x8x8xbf16>, vector<1x8x4xbf16>, vector<1x8x4xf32> -> vector<1x8x4xf32>
    "tpu.trace_stop"() : () -> ()
    %131 = tpu.reciprocal %128 {approx = true} : vector<1x8x1xf32> -> vector<1x8x1xf32>
    %132 = vector.broadcast %131 : vector<1x8x1xf32> to vector<1x8x4xf32>
    %133 = arith.mulf %130, %132 : vector<1x8x4xf32>
    %c0_75 = arith.constant 0 : index
    %c0_76 = arith.constant 0 : index
    %134 = vector.load %arg8[%c0_75, %c0_76] : memref<8x128xf32, #tpu.memory_space<vmem>>, vector<8x128xf32>
    %135 = vector.shape_cast %133 : vector<1x8x4xf32> to vector<8x4xf32>
    %136 = arith.truncf %135 : vector<8x4xf32> to vector<8x4xbf16>
    %c16_77 = arith.constant 16 : index
    %c0_78 = arith.constant 0 : index
    %137 = vector.load %arg4[%c16_77, %c0_78] : memref<32x128xbf16, #tpu.memory_space<vmem>>, vector<4x128xbf16>
    %cst_79 = arith.constant dense<0.000000e+00> : vector<8x128xf32>
    %138 = tpu.matmul %136, %137, %cst_79 {dimension_numbers = #tpu.dot_dimension_numbers<[1], [0], [0], [1], [0, 0, 1, 1], [], []>} : vector<8x4xbf16>, vector<4x128xbf16>, vector<8x128xf32> -> vector<8x128xf32>
    %139 = arith.addf %134, %138 : vector<8x128xf32>
    %c0_80 = arith.constant 0 : index
    %c0_81 = arith.constant 0 : index
    %140 = vector.load %arg8[%c0_80, %c0_81] : memref<8x128xf32, #tpu.memory_space<vmem>>, vector<8x128xf32>
    tpu.vector_store %arg8[%c0_80, %c0_81], %139 {strides = array<i32>} : memref<8x128xf32, #tpu.memory_space<vmem>>, vector<8x128xf32>,
    %c0_82 = arith.constant 0 : index
    %c20 = arith.constant 20 : index
    %141 = vector.load %arg7[%c0_82, %c20] : memref<8x128xbf16, #tpu.memory_space<vmem>>, vector<8x4xbf16>
    %142 = vector.shape_cast %141 : vector<8x4xbf16> to vector<1x8x4xbf16>
    %c0_83 = arith.constant 0 : index
    %c52 = arith.constant 52 : index
    %143 = vector.load %arg7[%c0_83, %c52] : memref<8x128xbf16, #tpu.memory_space<vmem>>, vector<8x4xbf16>
    %144 = vector.shape_cast %143 : vector<8x4xbf16> to vector<1x8x4xbf16>
    %c0_84 = arith.constant 0 : index
    %c84 = arith.constant 84 : index
    %145 = vector.load %arg7[%c0_84, %c84] : memref<8x128xbf16, #tpu.memory_space<vmem>>, vector<8x4xbf16>
    %146 = vector.shape_cast %145 : vector<8x4xbf16> to vector<1x8x4xbf16>
    "tpu.trace_start"() <{level = 10 : i32, message = "bqd,bkd->bqk"}> : () -> ()
    %cst_85 = arith.constant dense<0.000000e+00> : vector<1x8x8xf32>
    %147 = tpu.matmul %142, %144, %cst_85 {dimension_numbers = #tpu.dot_dimension_numbers<[2], [2], [1], [1], [0, 0, 0, 1, 1, 1], [0], [0]>} : vector<1x8x4xbf16>, vector<1x8x4xbf16>, vector<1x8x8xf32> -> vector<1x8x8xf32>
    "tpu.trace_stop"() : () -> ()
    %cst_86 = arith.constant dense<0xFF800000> : vector<1x8xf32>
    %148 = vector.multi_reduction <maximumf>, %147, %cst_86 [2] : vector<1x8x8xf32> to vector<1x8xf32>
    %149 = vector.shape_cast %148 : vector<1x8xf32> to vector<1x8x1xf32>
    %150 = vector.broadcast %149 : vector<1x8x1xf32> to vector<1x8x8xf32>
    %151 = arith.subf %147, %150 : vector<1x8x8xf32>
    %152 = math.exp %151 : vector<1x8x8xf32>
    %cst_87 = arith.constant dense<0.000000e+00> : vector<1x8xf32>
    %153 = vector.multi_reduction <add>, %152, %cst_87 [2] : vector<1x8x8xf32> to vector<1x8xf32>
    %154 = vector.shape_cast %153 : vector<1x8xf32> to vector<1x8x1xf32>
    %155 = arith.truncf %152 : vector<1x8x8xf32> to vector<1x8x8xbf16>
    "tpu.trace_start"() <{level = 10 : i32, message = "bqk,bkd->bqd"}> : () -> ()
    %cst_88 = arith.constant dense<0.000000e+00> : vector<1x8x4xf32>
    %156 = tpu.matmul %155, %146, %cst_88 {dimension_numbers = #tpu.dot_dimension_numbers<[2], [1], [1], [2], [0, 0, 0, 1, 1, 2], [0], [0]>} : vector<1x8x8xbf16>, vector<1x8x4xbf16>, vector<1x8x4xf32> -> vector<1x8x4xf32>
    "tpu.trace_stop"() : () -> ()
    %157 = tpu.reciprocal %154 {approx = true} : vector<1x8x1xf32> -> vector<1x8x1xf32>
    %158 = vector.broadcast %157 : vector<1x8x1xf32> to vector<1x8x4xf32>
    %159 = arith.mulf %156, %158 : vector<1x8x4xf32>
    %c0_89 = arith.constant 0 : index
    %c0_90 = arith.constant 0 : index
    %160 = vector.load %arg8[%c0_89, %c0_90] : memref<8x128xf32, #tpu.memory_space<vmem>>, vector<8x128xf32>
    %161 = vector.shape_cast %159 : vector<1x8x4xf32> to vector<8x4xf32>
    %162 = arith.truncf %161 : vector<8x4xf32> to vector<8x4xbf16>
    %c20_91 = arith.constant 20 : index
    %c0_92 = arith.constant 0 : index
    %163 = vector.load %arg4[%c20_91, %c0_92] : memref<32x128xbf16, #tpu.memory_space<vmem>>, vector<4x128xbf16>
    %cst_93 = arith.constant dense<0.000000e+00> : vector<8x128xf32>
    %164 = tpu.matmul %162, %163, %cst_93 {dimension_numbers = #tpu.dot_dimension_numbers<[1], [0], [0], [1], [0, 0, 1, 1], [], []>} : vector<8x4xbf16>, vector<4x128xbf16>, vector<8x128xf32> -> vector<8x128xf32>
    %165 = arith.addf %160, %164 : vector<8x128xf32>
    %c0_94 = arith.constant 0 : index
    %c0_95 = arith.constant 0 : index
    %166 = vector.load %arg8[%c0_94, %c0_95] : memref<8x128xf32, #tpu.memory_space<vmem>>, vector<8x128xf32>
    tpu.vector_store %arg8[%c0_94, %c0_95], %165 {strides = array<i32>} : memref<8x128xf32, #tpu.memory_space<vmem>>, vector<8x128xf32>,
    %c0_96 = arith.constant 0 : index
    %c24 = arith.constant 24 : index
    %167 = vector.load %arg7[%c0_96, %c24] : memref<8x128xbf16, #tpu.memory_space<vmem>>, vector<8x4xbf16>
    %168 = vector.shape_cast %167 : vector<8x4xbf16> to vector<1x8x4xbf16>
    %c0_97 = arith.constant 0 : index
    %c56 = arith.constant 56 : index
    %169 = vector.load %arg7[%c0_97, %c56] : memref<8x128xbf16, #tpu.memory_space<vmem>>, vector<8x4xbf16>
    %170 = vector.shape_cast %169 : vector<8x4xbf16> to vector<1x8x4xbf16>
    %c0_98 = arith.constant 0 : index
    %c88 = arith.constant 88 : index
    %171 = vector.load %arg7[%c0_98, %c88] : memref<8x128xbf16, #tpu.memory_space<vmem>>, vector<8x4xbf16>
    %172 = vector.shape_cast %171 : vector<8x4xbf16> to vector<1x8x4xbf16>
    "tpu.trace_start"() <{level = 10 : i32, message = "bqd,bkd->bqk"}> : () -> ()
    %cst_99 = arith.constant dense<0.000000e+00> : vector<1x8x8xf32>
    %173 = tpu.matmul %168, %170, %cst_99 {dimension_numbers = #tpu.dot_dimension_numbers<[2], [2], [1], [1], [0, 0, 0, 1, 1, 1], [0], [0]>} : vector<1x8x4xbf16>, vector<1x8x4xbf16>, vector<1x8x8xf32> -> vector<1x8x8xf32>
    "tpu.trace_stop"() : () -> ()
    %cst_100 = arith.constant dense<0xFF800000> : vector<1x8xf32>
    %174 = vector.multi_reduction <maximumf>, %173, %cst_100 [2] : vector<1x8x8xf32> to vector<1x8xf32>
    %175 = vector.shape_cast %174 : vector<1x8xf32> to vector<1x8x1xf32>
    %176 = vector.broadcast %175 : vector<1x8x1xf32> to vector<1x8x8xf32>
    %177 = arith.subf %173, %176 : vector<1x8x8xf32>
    %178 = math.exp %177 : vector<1x8x8xf32>
    %cst_101 = arith.constant dense<0.000000e+00> : vector<1x8xf32>
    %179 = vector.multi_reduction <add>, %178, %cst_101 [2] : vector<1x8x8xf32> to vector<1x8xf32>
    %180 = vector.shape_cast %179 : vector<1x8xf32> to vector<1x8x1xf32>
    %181 = arith.truncf %178 : vector<1x8x8xf32> to vector<1x8x8xbf16>
    "tpu.trace_start"() <{level = 10 : i32, message = "bqk,bkd->bqd"}> : () -> ()
    %cst_102 = arith.constant dense<0.000000e+00> : vector<1x8x4xf32>
    %182 = tpu.matmul %181, %172, %cst_102 {dimension_numbers = #tpu.dot_dimension_numbers<[2], [1], [1], [2], [0, 0, 0, 1, 1, 2], [0], [0]>} : vector<1x8x8xbf16>, vector<1x8x4xbf16>, vector<1x8x4xf32> -> vector<1x8x4xf32>
    "tpu.trace_stop"() : () -> ()
    %183 = tpu.reciprocal %180 {approx = true} : vector<1x8x1xf32> -> vector<1x8x1xf32>
    %184 = vector.broadcast %183 : vector<1x8x1xf32> to vector<1x8x4xf32>
    %185 = arith.mulf %182, %184 : vector<1x8x4xf32>
    %c0_103 = arith.constant 0 : index
    %c0_104 = arith.constant 0 : index
    %186 = vector.load %arg8[%c0_103, %c0_104] : memref<8x128xf32, #tpu.memory_space<vmem>>, vector<8x128xf32>
    %187 = vector.shape_cast %185 : vector<1x8x4xf32> to vector<8x4xf32>
    %188 = arith.truncf %187 : vector<8x4xf32> to vector<8x4xbf16>
    %c24_105 = arith.constant 24 : index
    %c0_106 = arith.constant 0 : index
    %189 = vector.load %arg4[%c24_105, %c0_106] : memref<32x128xbf16, #tpu.memory_space<vmem>>, vector<4x128xbf16>
    %cst_107 = arith.constant dense<0.000000e+00> : vector<8x128xf32>
    %190 = tpu.matmul %188, %189, %cst_107 {dimension_numbers = #tpu.dot_dimension_numbers<[1], [0], [0], [1], [0, 0, 1, 1], [], []>} : vector<8x4xbf16>, vector<4x128xbf16>, vector<8x128xf32> -> vector<8x128xf32>
    %191 = arith.addf %186, %190 : vector<8x128xf32>
    %c0_108 = arith.constant 0 : index
    %c0_109 = arith.constant 0 : index
    %192 = vector.load %arg8[%c0_108, %c0_109] : memref<8x128xf32, #tpu.memory_space<vmem>>, vector<8x128xf32>
    tpu.vector_store %arg8[%c0_108, %c0_109], %191 {strides = array<i32>} : memref<8x128xf32, #tpu.memory_space<vmem>>, vector<8x128xf32>,
    %c0_110 = arith.constant 0 : index
    %c28 = arith.constant 28 : index
    %193 = vector.load %arg7[%c0_110, %c28] : memref<8x128xbf16, #tpu.memory_space<vmem>>, vector<8x4xbf16>
    %194 = vector.shape_cast %193 : vector<8x4xbf16> to vector<1x8x4xbf16>
    %c0_111 = arith.constant 0 : index
    %c60 = arith.constant 60 : index
    %195 = vector.load %arg7[%c0_111, %c60] : memref<8x128xbf16, #tpu.memory_space<vmem>>, vector<8x4xbf16>
    %196 = vector.shape_cast %195 : vector<8x4xbf16> to vector<1x8x4xbf16>
    %c0_112 = arith.constant 0 : index
    %c92 = arith.constant 92 : index
    %197 = vector.load %arg7[%c0_112, %c92] : memref<8x128xbf16, #tpu.memory_space<vmem>>, vector<8x4xbf16>
    %198 = vector.shape_cast %197 : vector<8x4xbf16> to vector<1x8x4xbf16>
    "tpu.trace_start"() <{level = 10 : i32, message = "bqd,bkd->bqk"}> : () -> ()
    %cst_113 = arith.constant dense<0.000000e+00> : vector<1x8x8xf32>
    %199 = tpu.matmul %194, %196, %cst_113 {dimension_numbers = #tpu.dot_dimension_numbers<[2], [2], [1], [1], [0, 0, 0, 1, 1, 1], [0], [0]>} : vector<1x8x4xbf16>, vector<1x8x4xbf16>, vector<1x8x8xf32> -> vector<1x8x8xf32>
    "tpu.trace_stop"() : () -> ()
    %cst_114 = arith.constant dense<0xFF800000> : vector<1x8xf32>
    %200 = vector.multi_reduction <maximumf>, %199, %cst_114 [2] : vector<1x8x8xf32> to vector<1x8xf32>
    %201 = vector.shape_cast %200 : vector<1x8xf32> to vector<1x8x1xf32>
    %202 = vector.broadcast %201 : vector<1x8x1xf32> to vector<1x8x8xf32>
    %203 = arith.subf %199, %202 : vector<1x8x8xf32>
    %204 = math.exp %203 : vector<1x8x8xf32>
    %cst_115 = arith.constant dense<0.000000e+00> : vector<1x8xf32>
    %205 = vector.multi_reduction <add>, %204, %cst_115 [2] : vector<1x8x8xf32> to vector<1x8xf32>
    %206 = vector.shape_cast %205 : vector<1x8xf32> to vector<1x8x1xf32>
    %207 = arith.truncf %204 : vector<1x8x8xf32> to vector<1x8x8xbf16>
    "tpu.trace_start"() <{level = 10 : i32, message = "bqk,bkd->bqd"}> : () -> ()
    %cst_116 = arith.constant dense<0.000000e+00> : vector<1x8x4xf32>
    %208 = tpu.matmul %207, %198, %cst_116 {dimension_numbers = #tpu.dot_dimension_numbers<[2], [1], [1], [2], [0, 0, 0, 1, 1, 2], [0], [0]>} : vector<1x8x8xbf16>, vector<1x8x4xbf16>, vector<1x8x4xf32> -> vector<1x8x4xf32>
    "tpu.trace_stop"() : () -> ()
    %209 = tpu.reciprocal %206 {approx = true} : vector<1x8x1xf32> -> vector<1x8x1xf32>
    %210 = vector.broadcast %209 : vector<1x8x1xf32> to vector<1x8x4xf32>
    %211 = arith.mulf %208, %210 : vector<1x8x4xf32>
    %c0_117 = arith.constant 0 : index
    %c0_118 = arith.constant 0 : index
    %212 = vector.load %arg8[%c0_117, %c0_118] : memref<8x128xf32, #tpu.memory_space<vmem>>, vector<8x128xf32>
    %213 = vector.shape_cast %211 : vector<1x8x4xf32> to vector<8x4xf32>
    %214 = arith.truncf %213 : vector<8x4xf32> to vector<8x4xbf16>
    %c28_119 = arith.constant 28 : index
    %c0_120 = arith.constant 0 : index
    %215 = vector.load %arg4[%c28_119, %c0_120] : memref<32x128xbf16, #tpu.memory_space<vmem>>, vector<4x128xbf16>
    %cst_121 = arith.constant dense<0.000000e+00> : vector<8x128xf32>
    %216 = tpu.matmul %214, %215, %cst_121 {dimension_numbers = #tpu.dot_dimension_numbers<[1], [0], [0], [1], [0, 0, 1, 1], [], []>} : vector<8x4xbf16>, vector<4x128xbf16>, vector<8x128xf32> -> vector<8x128xf32>
    %217 = arith.addf %212, %216 : vector<8x128xf32>
    %c0_122 = arith.constant 0 : index
    %c0_123 = arith.constant 0 : index
    %218 = vector.load %arg8[%c0_122, %c0_123] : memref<8x128xf32, #tpu.memory_space<vmem>>, vector<8x128xf32>
    tpu.vector_store %arg8[%c0_122, %c0_123], %217 {strides = array<i32>} : memref<8x128xf32, #tpu.memory_space<vmem>>, vector<8x128xf32>,
    %c0_124 = arith.constant 0 : index
    %c0_125 = arith.constant 0 : index
    %219 = vector.load %arg8[%c0_124, %c0_125] : memref<8x128xf32, #tpu.memory_space<vmem>>, vector<8x128xf32>
    %c0_126 = arith.constant 0 : index
    %c0_127 = arith.constant 0 : index
    %220 = vector.load %arg5[%c0_126, %c0_127] : memref<1x128xf32, #tpu.memory_space<vmem>>, vector<1x128xf32>
    %221 = vector.broadcast %220 : vector<1x128xf32> to vector<8x128xf32>
    %222 = arith.addf %219, %221 : vector<8x128xf32>
    %223 = vector.shape_cast %222 : vector<8x128xf32> to vector<1x8x128xf32>
    %c0_128 = arith.constant 0 : index
    %c0_129 = arith.constant 0 : index
    %c0_130 = arith.constant 0 : index
    %224 = vector.load %arg6[%c0_128, %c0_129, %c0_130] : memref<1x8x128xf32, #tpu.memory_space<vmem>>, vector<1x8x128xf32>
    tpu.vector_store %arg6[%c0_128, %c0_129, %c0_130], %223 {strides = array<i32>} : memref<1x8x128xf32, #tpu.memory_space<vmem>>, vector<1x8x128xf32>,
    return
  }
  func.func @transform_0(%arg0: i32) -> (i32, i32, i32) {
    %c0_i32 = arith.constant 0 : i32
    %c0_i32_0 = arith.constant 0 : i32
    %c0_i32_1 = arith.constant 0 : i32
    return %arg0, %c0_i32, %c0_i32_0 : i32, i32, i32
  }
  func.func @transform_1(%arg0: i32) -> (i32, i32) {
    %c0_i32 = arith.constant 0 : i32
    %c0_i32_0 = arith.constant 0 : i32
    %c0_i32_1 = arith.constant 0 : i32
    return %c0_i32, %c0_i32_0 : i32, i32
  }
  func.func @transform_2(%arg0: i32) -> (i32, i32) {
    %c0_i32 = arith.constant 0 : i32
    %c0_i32_0 = arith.constant 0 : i32
    %c0_i32_1 = arith.constant 0 : i32
    return %c0_i32, %c0_i32_0 : i32, i32
  }
  func.func @transform_3(%arg0: i32) -> (i32, i32) {
    %c0_i32 = arith.constant 0 : i32
    %c0_i32_0 = arith.constant 0 : i32
    %c0_i32_1 = arith.constant 0 : i32
    return %c0_i32, %c0_i32_0 : i32, i32
  }
  func.func @transform_4(%arg0: i32) -> (i32, i32) {
    %c0_i32 = arith.constant 0 : i32
    %c0_i32_0 = arith.constant 0 : i32
    %c0_i32_1 = arith.constant 0 : i32
    return %c0_i32, %c0_i32_0 : i32, i32
  }
  func.func @transform_5(%arg0: i32) -> (i32, i32, i32) {
    %c0_i32 = arith.constant 0 : i32
    %c0_i32_0 = arith.constant 0 : i32
    %c0_i32_1 = arith.constant 0 : i32
    return %arg0, %c0_i32, %c0_i32_0 : i32, i32, i32
  }
}

</mosaic_0001>

<bundles_post_ra>
// kernel: tpu_custom_call.1
= control target key start
LH: loop header
LB: loop body
LE: loop exit
PB: predicated region body
PF: predicated region fallthrough
CT: control target
= control target key end

     0   :  { %10 = vsyncpa [#allocation5], 0  ;;  %s2887_s0 = inlined_call_operand.hbm [shape: bf16[2,8,128], index: 0, kind: input, shape index: {}]   ;;  %s2888_s1 = inlined_call_operand.hbm [shape: bf16[128,128], index: 1, kind: input, shape index: {}]   ;;  %s2889_s2 = inlined_call_operand.vmem [shape: f32[1,128], index: 2, kind: input, shape index: {}]   ;;  %s2890_s3 = inlined_call_operand.hbm [shape: bf16[32,128], index: 3, kind: input, shape index: {}]   ;;  %s2891_s4 = inlined_call_operand.vmem [shape: f32[1,128], index: 4, kind: input, shape index: {}]   ;;  %s2892_s5 = inlined_call_operand.hbm [shape: f32[2,8,128], index: 5, kind: output, shape index: {}]  }
   0x1   :  { %12 = vsyncpa [#allocation5 + $0x1], 0 }
   0x2   :  { %13 = vsyncpa [#allocation8], 0 }
   0x3   :  { %14 = vsyncpa [#allocation6], 0 }
   0x4   :  { %16 = vsyncpa [#allocation6 + $0x1], 0  ;;  %s2484_s18 = smov 0   ;;  %s2486_s19 = smov 0  }
   0x5   :  { %s2488_s20 = smov 0   ;;  %s2490_s21 = smov 0  }
   0x6 LB: > { %s2505_s22 = sadd.s32 4294967295, %s2421_s21   ;;  %s1836_s23 = sadd.s32 4294967294, %s2421_s21   ;;  %s2421_s21 = sphi %s2490_s21, %s2912_s21   ;;  %s2417_s20 = sphi %s2488_s20, %s2911_s20   ;;  %s2413_s19 = sphi %s2486_s19, %s2910_s19   ;;  %s2409_s18 = sphi %s2484_s18, %s2909_s18  }
   0x7   : > { %p42_p0 = scmp.ne.s32.totalorder %s2413_s19, %s2409_s18  ;;  %p2893_p1 = scmp.eq.s32.totalorder %s2505_s22, 0 }
   0x8   : > { %p156_p3 = scmp.eq.s32.totalorder %s1836_s23, 1  ;;  %p1837_p5 = scmp.ge.s32.totalorder %s2421_s21, 1 }
   0x9   : > { %p2514_p4 = por %p2893_p1, %p42_p0  ;;  %p163_p7 = scmp.lt.s32.totalorder %s2421_s21, 3 }
   0xa   : > { %p2519_p6 = por %p156_p3, %p42_p0  ;;  %s2423_s27 = smov [#allocation7]  }
   0xb   : > { %s2896_s24 = scalar_select %p2514_p4, 1, 0 }
   0xc   : > { %s2897_s25 = scalar_select %p2519_p6, 1, 0 }
   0xd   : > { %p2524_p8 = pnand %p1837_p5, %p163_p7  ;;  %s175_s28 = sshll.u32 %s2423_s27, 4  ;;  %s2528_s28 = int_to_ptr.vmem [resolvable:$true] %s175_s28 }
   0xe   : > { %s2424_s30 = smov [#allocation9]   ;;  %s2265_s9 = scalar_lea.hbm %s2888_s1, 1024 }
   0xf   : > { %p2131_p9 = pneg %p2524_p8  ;;  %s191_s6 = sshll.u32 %s2424_s30, 4  ;;  %s2539_s6 = int_to_ptr.vmem [resolvable:$true] %s191_s6 }
  0x10   : > { %p2266_p12 = scmp.ne.s32.totalorder %s2888_s1, %s2265_s9  ;;  %p2272_p5 = scmp.lt.u32.totalorder %s2265_s9, %s2888_s1 }
  0x11   : > { %p2535_p11 = pnand %p2131_p9, %p2893_p1 }
  0x13   : > { %p2267_p13 = pneg %p2535_p11 }
  0x15   : > { %p2268_p0 = pnand %p2267_p13, %p2266_p12 }
  0x17   : > { %p2269_p3 = pneg %p2268_p0 }
  0x19   : > { %p2274_p7 = pnand %p2272_p5, %p2269_p3 }
  0x1b   : > { %2277 = shalt.err (!%p2274_p7)
}
  0x1c   : > { %s2278_s14 = scalar_lea.vmem %s2528_s28, 1024  ;;  %p2286_p2 = scmp.lt.s32.totalorder %s2528_s28, %s2528_s28 }
  0x1d   : > { %p2279_p9 = scmp.ne.s32.totalorder %s2528_s28, %s2278_s14  ;;  %p2287_p12 = scmp.lt.s32.totalorder %s2278_s14, %s2278_s14 }
  0x1f   : > { %p2281_p10 = pnand %p2279_p9, %p2267_p13  ;;  %p2288_p0 = por %p2287_p12, %p2286_p2 }
  0x21   : > { %p2282_p1 = pneg %p2281_p10 }
  0x23   : > { %p2289_p6 = pnand %p2288_p0, %p2282_p1 }
  0x25   : > { %2292 = shalt.err (!%p2289_p6)
}
  0x26   : > { %s2425_s15 = smov 64   ;;  %s2426_s16 = smov 4  }
  0x27   : > { %2134 = dma.hbm_to_vmem [thread:$0]  (!%p2535_p11), %s2888_s1, 1024, %s2528_s28, [#allocation8], %s2425_s15, %s2425_s15, %s2426_s16  }
  0x28   : > { %s2293_s7 = scalar_lea.hbm %s2890_s3, 256 }
  0x29   : > { %p2294_p2 = scmp.ne.s32.totalorder %s2890_s3, %s2293_s7  ;;  %p2300_p10 = scmp.lt.u32.totalorder %s2293_s7, %s2890_s3 }
  0x2b   : > { %p2296_p1 = pnand %p2294_p2, %p2267_p13 }
  0x2d   : > { %p2297_p6 = pneg %p2296_p1 }
  0x2f   : > { %p2302_p3 = pnand %p2300_p10, %p2297_p6 }
  0x31   : > { %2305 = shalt.err (!%p2302_p3)
}
  0x32   : > { %s2306_s28 = scalar_lea.vmem %s2539_s6, 256  ;;  %p2314_p12 = scmp.lt.s32.totalorder %s2539_s6, %s2539_s6 }
  0x33   : > { %p2307_p5 = scmp.ne.s32.totalorder %s2539_s6, %s2306_s28  ;;  %p2315_p0 = scmp.lt.s32.totalorder %s2306_s28, %s2306_s28 }
  0x35   : > { %p2309_p7 = pnand %p2307_p5, %p2267_p13  ;;  %p2316_p2 = por %p2315_p0, %p2314_p12 }
  0x37   : > { %p2310_p9 = pneg %p2309_p7 }
  0x39   : > { %p2317_p1 = pnand %p2316_p2, %p2310_p9 }
  0x3b   : > { %2320 = shalt.err (!%p2317_p1)
}
  0x3c   : > { %2137 = dma.hbm_to_vmem [thread:$0]  (!%p2535_p11), %s2890_s3, 256, %s2539_s6, [#allocation8], %s2425_s15, %s2425_s15, %s2426_s16  }
  0x3d   : > { %s2594_s14 = sadd.s32 1, %s2421_s21   ;;  %s29_s29 = sadd.s32 1, %s2417_s20 }
  0x3e   : > { %s26_s17 = ssub.s32 %s2421_s21, %s2594_s14  ;;  %p36_p13 = scmp.ne.s32.totalorder %s2417_s20, %s2413_s19 }
  0x3f   : > { %p27_p6 = scmp.eq.s32.totalorder %s26_s17, 0  ;;  %p37_p10 = scmp.eq.s32.totalorder %s2421_s21, 0 }
  0x40   : > { %p2900_p3 = scmp.eq.s32.totalorder %s2505_s22, 1  ;;  %p2148_p7 = scmp.lt.s32.totalorder %s2421_s21, 2 }
  0x41   : > { %s2610_s27 = scalar_select %p27_p6, %s2417_s20, %s29_s29  }
  0x42   : > { %p2604_p5 = por %p2900_p3, %p36_p13  ;;  %p38_p9 = por %p37_p10, %p36_p13 }
  0x43   : > { %s208_s30 = sand.u32 1, %s2417_s20   ;;  %s1842_s6 = sshll.u32 %s2421_s21, 6 }
  0x44   : > { %s2901_s23 = scalar_select %p2604_p5, 1, 0 }
  0x45   : > { %s1841_s7 = sshll.u32 %s208_s30, 2  ;;  %s2617_s8 = scalar_lea.hbm %s2887_s0, %s1842_s6 }
  0x46   : > { %s212_s9 = scalar_lea.vmem [#allocation4], %s1841_s7  ;;  %p2621_p11 = pnand %p2148_p7, %p38_p9 }
  0x47   : > { %s219_s10 = sshll.u32 %s212_s9, 4  ;;  %s209_s28 = scalar_lea.sflag [#allocation5], %s208_s30  ;;  %s2619_s10 = int_to_ptr.vmem [resolvable:$true] %s219_s10 }
  0x48   : > { %s2321_s12 = scalar_lea.hbm %s2617_s8, 64  ;;  %p2323_p0 = pneg %p2621_p11 }
  0x49   : > { %p2322_p12 = scmp.ne.s32.totalorder %s2617_s8, %s2321_s12  ;;  %s2326_s17 = scalar_lea.hbm %s2887_s0, 128 }
  0x4a   : > { %p2327_p13 = scmp.lt.u32.totalorder %s2617_s8, %s2887_s0  ;;  %p2328_p6 = scmp.lt.u32.totalorder %s2326_s17, %s2321_s12 }
  0x4b   : > { %p2324_p2 = pnand %p2323_p0, %p2322_p12  ;;  %p2330_p3 = scmp.lt.u32.totalorder %s2321_s12, %s2617_s8 }
  0x4c   : > { %p2329_p10 = por %p2328_p6, %p2327_p13 }
  0x4d   : > { %p2325_p1 = pneg %p2324_p2 }
  0x4e   : > { %p2331_p7 = por %p2330_p3, %p2329_p10 }
  0x50   : > { %p2332_p9 = pnand %p2331_p7, %p2325_p1 }
  0x52   : > { %2335 = shalt.err (!%p2332_p9)
}
  0x53   : > { %s2336_s30 = scalar_lea.vmem %s2619_s10, 64  ;;  %s2427_s15 = smov [#allocation4]  }
  0x54   : > { %p2337_p12 = scmp.ne.s32.totalorder %s2619_s10, %s2336_s30  ;;  %s2341_s16 = sshll.u32 %s2427_s15, 4  ;;  %s2342_s16 = int_to_ptr.vmem [resolvable:$false] %s2341_s16 }
  0x55   : > { %s2343_s9 = scalar_lea.vmem %s2342_s16, 128  ;;  %p2344_p4 = scmp.lt.s32.totalorder %s2619_s10, %s2342_s16 }
  0x56   : > { %p2339_p2 = pnand %p2337_p12, %p2323_p0  ;;  %p2345_p13 = scmp.lt.s32.totalorder %s2343_s9, %s2336_s30 }
  0x58   : > { %p2340_p5 = pneg %p2339_p2  ;;  %p2346_p6 = por %p2345_p13, %p2344_p4 }
  0x5a   : > { %p2347_p10 = pnand %p2346_p6, %p2340_p5 }
  0x5c   : > { %2350 = shalt.err (!%p2347_p10)
}
  0x5d   : > { %2141 = dma.hbm_to_vmem [thread:$0]  (!%p2621_p11), %s2617_s8, 64, %s2619_s10, %s209_s28  }
  0x5e   : > { %228 = sbr.rel (%p2524_p8) target bundleno = 4182 (0x1056), region = 40  ;;  %s2653_s12 = sand.u32 (!%p2524_p8), 1, %s2413_s19  }
  0x5f   : > { %s1844_s13 = sshll.u32 (!%p2524_p8), %s2653_s12, 2  ;;  %s231_s29 = scalar_lea.sflag (!%p2524_p8), [#allocation5], %s2653_s12 }
  0x60   : > { %s2657_s17 = scalar_lea.vmem (!%p2524_p8), [#allocation4], %s1844_s13  ;;  %p2903_p4 = scmp.ne.s32.totalorder (!%p2524_p8), %s2896_s24, 0 }
  0x65   : > { %2396 = dma.done.wait (%p2903_p4), %s231_s29, 64  }
  0x66   : > { %2398 = vsyncadd (%p2903_p4), %s231_s29, 4294967232  ;;  %p2904_p5 = scmp.eq.s32.totalorder %s2505_s22, 0 }
  0x68   : > { %2400 = dma.done.wait (%p2904_p5), [#allocation8], 1280   ;;  %p2905_p8 = pmov %p2904_p5 }
  0x69   : > { %v2428_v0 = vmov 0.0   ;;  %vm2429_vm0 = vmmov 0   ;;  %v2213_v1 = vld [vmem:[#allocation7] sm:$0xff]   ;;  %v2214_v2 = vld [vmem:[#allocation7 + $0x8] sm:$0xff]   ;;  %v2215_v3 = vld [vmem:[#allocation7 + $0x10] sm:$0xff]   ;;  %s2430_s8 = smov 64  }
  0x6a   : > { %2402 = vsyncadd (%p2905_p8), [#allocation8], 4294966016  ;;  %1955 = vmatprep.subr.bf16.mxu0 %v2428_v0  ;;  %1971 = vmatprep.mubr.msk.bf16.mxu0 %vm2429_vm0, %v2428_v0  ;;  %v2216_v4 = vld [vmem:[#allocation7 + $0x18] sm:$0xff]   ;;  %v2217_v5 = vld [vmem:[#allocation7 + $0x20] sm:$0xff]   ;;  %s2431_s10 = smov 96   ;;  %vm391_vm1 = vcmask 31744  }
  0x6b   : > { %1975 = vmatprep.subr.bf16.mxu1 %v2428_v0  ;;  %1977 = vmatprep.mubr.msk.bf16.mxu1 %vm2429_vm0, %v2428_v0  ;;  %v2218_v6 = vld [vmem:[#allocation7 + $0x28] sm:$0xff]   ;;  %v2219_v7 = vld [vmem:[#allocation7 + $0x30] sm:$0xff]   ;;  %v2220_v8 = vld [vmem:[#allocation7 + $0x38] sm:$0xff]   ;;  %vm454_vm2 = vcmask 1043456   ;;  %vm438_vm3 = vcmask 64512   ;;  %s2432_s11 = smov 92  }
  0x6c   : > { %1956 = vmatpush3.bf16.msra.mxu0 %v2213_v1  ;;  %v270_v9 = vld [vmem:[%s2657_s17] sm:$0xf]  ;;  %v1848_v10 = vld [vmem:[%s2889_s2] ss:$0 sm:$0xff]  ;;  %s2433_s28 = smov 124   ;;  %s2434_s7 = smov 60  }
  0x6d   : > { %1957 = vmatprep.subr.bf16.mxu0 %v2428_v0  ;;  %s2435_s6 = smov 88   ;;  %s2436_s30 = smov 120   ;;  %v502_v36 = vld [vmem:[#allocation9] sm:$0x3]  ;;  %vm506_vm4 = vcmask 1041408  }
  0x6e   : > { %v508_v37 = vsel %vm506_vm4, %v502_v36, 0  ;;  %s2437_s15 = smov 84   ;;  %s2438_s16 = smov 56  }
  0x6f   : > { %s2439_s9 = smov 116   ;;  %s2440_s13 = smov 52  }
  0x70   : > { %1958 = vmatpush3.bf16.msra.mxu0 %v2214_v2  ;;  %s2441_s29 = smov 112   ;;  %s2442_s17 = smov 80  }
  0x71   : > { %1959 = vmatprep.subr.bf16.mxu0 %v2428_v0  ;;  %s2443_s24 = smov 48   ;;  %s2444_s26 = smov 108  }
  0x72   : > { %p2906_p0 = scmp.ne.s32.totalorder %s2901_s23, 0 }
  0x74   : > { %1960 = vmatpush3.bf16.msra.mxu0 %v2215_v3 }
  0x75   : > { %1961 = vmatprep.subr.bf16.mxu0 %v2428_v0 }
  0x78   : > { %1962 = vmatpush3.bf16.msra.mxu0 %v2216_v4 }
  0x79   : > { %1963 = vmatprep.subr.bf16.mxu0 %v2428_v0 }
  0x7c   : > { %1964 = vmatpush3.bf16.msra.mxu0 %v2217_v5 }
  0x7d   : > { %1965 = vmatprep.subr.bf16.mxu0 %v2428_v0 }
  0x80   : > { %1966 = vmatpush3.bf16.msra.mxu0 %v2218_v6 }
  0x81   : > { %1967 = vmatprep.subr.bf16.mxu0 %v2428_v0 }
  0x84   : > { %1968 = vmatpush3.bf16.msra.mxu0 %v2219_v7  ;;  %v2225_v7 = vld [vmem:[#allocation9] ss:$0 sps:$4 sm:$0xcc]  }
  0x85   : > { %1969 = vmatprep.subr.bf16.mxu0 %v2428_v0 }
  0x88   : > { %1970 = vmatpush3.bf16.msra.mxu0 %v2220_v8  ;;  %v672_v8 = vrot.slane %v2225_v7, 2 }
  0x89   : > { %1999 = vmatprep.subr.bf16.mxu0 %v2428_v0 }
  0x8b   : > { %1972 = vmatmul.mubr.bf16.vlgmr.msra.gmra.mrb[0].mxu0 %v270_v9  ;;  %v677_v9 = vsel %vm506_vm4, %v672_v8, 0 }
  0x8c   : > { %2001 = vmatprep.mubr.msk.bf16.mxu0 %vm2429_vm0, %v2428_v0 }
 0x15e   : > { %v376_v11 = vpop.f32.mrb[0].mxu0 }
 0x15f   : > { %v377_v12 = vadd.f32 %v1848_v10, %v376_v11  ;;  %v1973_v13 = vpop.f32.mrb[1].mxu0 }
 0x160   : > { %v379_v14 = vpop.f32.mrb[2].mxu0 }
 0x161   : > { %v382_v15 = vpack.c.bf16 %v377_v12, %v377_v12  ;;  %v1974_v16 = vpop.f32.mrb[3].mxu0 }
 0x163   : > { %383 = vst [vmem:[#allocation2] sm:$0xf] %v382_v15 }
 0x16a   : > { %v385_v17 = vld [vmem:[#allocation2] sm:$0xf] }
 0x16b   : > { %v1857_v18 = vcombine.low %v385_v17, %v385_v17  ;;  %v2222_v28 = vld [vmem:[#allocation2] ss:$0 sps:$4 sm:$0xff]  }
 0x16c   : > { %v2699_v35 = vld [vmem:[#allocation2] ss:$0 sps:$4 sm:$0xff]  }
 0x16d   : > { %449 = vrot.lane.b32.xlu1 %v1857_v18, %s2430_s8  ;;  %389 = vrot.lane.b32.xlu0 %v1857_v18, %s2431_s10  ;;  %v2224_v6 = vld [vmem:[#allocation2] ss:$0 sps:$4 sm:$0xff]   ;;  %s2445_s8 = smov 76   ;;  %s2446_s10 = smov 72  }
 0x1df   : > { %v390_v19 = vpop.permute.xlu0 %389  ;;  %v450_v21 = vpop.permute.xlu1 %449 }
 0x1e0   : > { %v396_v20 = vsel %vm391_vm1, %v390_v19, 0  ;;  %v456_v22 = vsel %vm454_vm2, %v450_v21, 0 }
 0x1e1   : > { %1976 = vmatpush3.bf16.xpose.msra.mxu1 %v396_v20 }
 0x1e2   : > { %1981 = vmatprep.subr.bf16.mxu1 %v2428_v0 }
 0x1e8   : > { %1978 = vmatmul.mubr.msk.bf16.vlgmr.msra.gmra.mrb[0].mxu1 %vm391_vm1, %v385_v17 }
 0x1e9   : > { %1982 = vmatpush3.bf16.msra.mxu1 %v456_v22  ;;  %1983 = vmatprep.mubr.msk.bf16.mxu1 %vm2429_vm0, %v2428_v0 }
 0x1ea   : > { %1987 = vmatprep.subr.bf16.mxu1 %v2428_v0 }
 0x2bb   : > { %v432_v23 = vpop.f32.mrb[0].mxu1 }
 0x2bc   : > { %v1979_v24 = vpop.f32.mrb[1].mxu1  ;;  %v439_v25 = vsel %vm438_vm3, %v432_v23, -inf }
 0x2bd   : > { %440 = vmax.xlane.f32.xlu0 %v439_v25  ;;  %v435_v26 = vpop.f32.mrb[2].mxu1 }
 0x2be   : > { %v1980_v27 = vpop.f32.mrb[3].mxu1 }
 0x2d3   : > { %558 = vrot.lane.b32.xlu0 %v2222_v28, %s2432_s11  ;;  %s2447_s11 = smov 104  }
 0x34a   : > { %v441_v29 = vpop.xlane.xlu0 %440 }
 0x34b   : > { %v442_v30 = vsub.f32 %v432_v23, %v441_v29 }
 0x34d   : > { %v443_v31 = vmul.f32 1.442695, %v442_v30 }
 0x34e   : > { %v559_v46 = vpop.permute.xlu0 %558 }
 0x34f   : > { %2233 = vpow2.f32 %v443_v31  ;;  %v564_v50 = vsel %vm391_vm1, %v559_v46, 0 }
 0x359   : > { %v2234_v32 = vpop.eup %2233 }
 0x35a   : > { %v445_v33 = vsel %vm438_vm3, %v2234_v32, 0.0  ;;  %v448_v34 = vpack.c.bf16 %v2234_v32, %v2234_v32 }
 0x35b   : > { %446 = vadd.xlane.f32.xlu1 %v445_v33 }
 0x35c   : > { %1984 = vmatmul.mubr.msk.bf16.vlgmr.msra.gmra.mrb[4].mxu1 %vm438_vm3, %v448_v34  ;;  %v2226_v34 = vld [vmem:[#allocation2] ss:$0 sps:$4 sm:$0xff]  }
 0x35d   : > { %1989 = vmatprep.mubr.msk.bf16.mxu1 %vm2429_vm0, %v2428_v0  ;;  %1988 = vmatpush3.bf16.msra.mxu1 %v508_v37 }
 0x35e   : > { %1993 = vmatprep.subr.bf16.mxu1 %v2428_v0 }
 0x36c   : > { %556 = vrot.lane.b32.xlu1 %v2222_v28, %s2433_s28  ;;  %s2448_s28 = smov 44  }
 0x370   : > { %616 = vrot.lane.b32.xlu1 %v2222_v28, %s2434_s7  ;;  %s2449_s7 = smov 40  }
 0x374   : > { %727 = vrot.lane.b32.xlu1 %v2699_v35, %s2435_s6  ;;  %s2450_s6 = smov 100  }
 0x378   : > { %725 = vrot.lane.b32.xlu1 %v2699_v35, %s2436_s30  ;;  %s2451_s30 = smov 68  }
 0x3e8   : > { %v447_v38 = vpop.xlane.xlu1 %446 }
 0x3e9   : > { %2235 = vrcp.f32 %v447_v38 }
 0x3ec   : > { %v557_v39 = vpop.permute.xlu1 %556 }
 0x3f0   : > { %v617_v40 = vpop.permute.xlu1 %616 }
 0x3f1   : > { %v622_v41 = vsel %vm454_vm2, %v617_v40, 0  ;;  %v837_v40 = vld [vmem:[#allocation9 + $0x4] sm:$0x3] }
 0x3f2   : > { %2000 = vmatpush3.bf16.msra.mxu0 %v622_v41  ;;  %v842_v41 = vsel %vm506_vm4, %v837_v40, 0 }
 0x3f3   : > { %2011 = vmatprep.subr.bf16.mxu0 %v2428_v0  ;;  %v2236_v42 = vpop.eup %2235 }
 0x3f4   : > { %v728_v1 = vpop.permute.xlu1 %727 }
 0x3f5   : > { %v733_v4 = vsel %vm391_vm1, %v728_v1, 0 }
 0x3f8   : > { %v726_v5 = vpop.permute.xlu1 %725 }
 0x42f   : > { %v492_v43 = vpop.f32.mrb[4].mxu1 }
 0x430   : > { %v499_v44 = vmul.f32 %v2236_v42, %v492_v43  ;;  %v1985_v45 = vpop.f32.mrb[5].mxu1 }
 0x431   : > { %v495_v47 = vpop.f32.mrb[6].mxu1 }
 0x432   : > { %v501_v48 = vpack.c.bf16 %v499_v44, %v499_v44  ;;  %v1986_v49 = vpop.f32.mrb[7].mxu1 }
 0x434   : > { %1990 = vmatmul.mubr.msk.bf16.vlgmr.msra.gmra.mrb[8].mxu1 %vm391_vm1, %v501_v48 }
 0x435   : > { %1994 = vmatpush3.bf16.xpose.msra.mxu1 %v564_v50  ;;  %1995 = vmatprep.mubr.msk.bf16.mxu1 %vm2429_vm0, %v2428_v0 }
 0x436   : > { %2005 = vmatprep.subr.bf16.mxu1 %v2428_v0 }
 0x43c   : > { %1996 = vmatmul.mubr.msk.bf16.vlgmr.msra.gmra.mrb[12].mxu1 %vm391_vm1, %v557_v39 }
 0x43d   : > { %2007 = vmatprep.mubr.msk.bf16.mxu1 %vm2429_vm0, %v2428_v0  ;;  %2006 = vmatpush3.bf16.msra.mxu1 %v677_v9  ;;  %v2228_v9 = vld [vmem:[#allocation9 + $0x4] ss:$0 sps:$4 sm:$0xcc]  }
 0x43e   : > { %2017 = vmatprep.subr.bf16.mxu1 %v2428_v0 }
 0x507   : > { %v2715_v51 = vpop.f32.mrb[8].mxu1 }
 0x508   : > { %v1991_v52 = vpop.f32.mrb[9].mxu1 }
 0x509   : > { %v547_v53 = vpop.f32.mrb[10].mxu1 }
 0x50a   : > { %v1992_v54 = vpop.f32.mrb[11].mxu1 }
 0x50f   : > { %v600_v55 = vpop.f32.mrb[12].mxu1 }
 0x510   : > { %v1997_v56 = vpop.f32.mrb[13].mxu1  ;;  %v606_v57 = vsel %vm438_vm3, %v600_v55, -inf }
 0x511   : > { %607 = vmax.xlane.f32.xlu0 %v606_v57  ;;  %v603_v58 = vpop.f32.mrb[14].mxu1 }
 0x512   : > { %v1998_v59 = vpop.f32.mrb[15].mxu1 }
 0x59e   : > { %v608_v60 = vpop.xlane.xlu0 %607 }
 0x59f   : > { %v609_v61 = vsub.f32 %v600_v55, %v608_v60 }
 0x5a1   : > { %v610_v62 = vmul.f32 1.442695, %v609_v61 }
 0x5a3   : > { %2237 = vpow2.f32 %v610_v62 }
 0x5ad   : > { %v2238_v63 = vpop.eup %2237 }
 0x5ae   : > { %v612_v2 = vsel %vm438_vm3, %v2238_v63, 0.0  ;;  %v615_v3 = vpack.c.bf16 %v2238_v63, %v2238_v63 }
 0x5af   : > { %613 = vadd.xlane.f32.xlu1 %v612_v2 }
 0x5b0   : > { %2002 = vmatmul.mubr.msk.bf16.vlgmr.msra.gmra.mrb[4].mxu0 %vm438_vm3, %v615_v3  ;;  %v2763_v3 = vld [vmem:[#allocation2] ss:$0 sps:$4 sm:$0xff]  }
 0x5b1   : > { %2012 = vmatpush3.bf16.xpose.msra.mxu0 %v733_v4  ;;  %2013 = vmatprep.mubr.msk.bf16.mxu0 %vm2429_vm0, %v2428_v0 }
 0x5b2   : > { %2023 = vmatprep.subr.bf16.mxu0 %v2428_v0 }
 0x5b8   : > { %2014 = vmatmul.mubr.msk.bf16.vlgmr.msra.gmra.mrb[8].mxu0 %vm391_vm1, %v726_v5 }
 0x5b9   : > { %2025 = vmatprep.mubr.msk.bf16.mxu0 %vm2429_vm0, %v2428_v0  ;;  %2024 = vmatpush3.bf16.msra.mxu0 %v842_v41 }
 0x5ba   : > { %2035 = vmatprep.subr.bf16.mxu0 %v2428_v0 }
 0x5c0   : > { %892 = vrot.lane.b32.xlu1 %v2224_v6, %s2437_s15  ;;  %s2452_s15 = smov 36  }
 0x63c   : > { %v614_v10 = vpop.xlane.xlu1 %613 }
 0x63d   : > { %2239 = vrcp.f32 %v614_v10  ;;  %v1006_v10 = vrot.slane %v2228_v9, 2 }
 0x640   : > { %v893_v29 = vpop.permute.xlu1 %892 }
 0x641   : > { %v898_v32 = vsel %vm391_vm1, %v893_v29, 0 }
 0x647   : > { %v2240_v11 = vpop.eup %2239 }
 0x683   : > { %v658_v12 = vpop.f32.mrb[4].mxu0 }
 0x684   : > { %v665_v13 = vmul.f32 %v2240_v11, %v658_v12  ;;  %v2003_v14 = vpop.f32.mrb[5].mxu0  ;;  %v1011_v11 = vsel %vm506_vm4, %v1006_v10, 0 }
 0x685   : > { %v661_v15 = vpop.f32.mrb[6].mxu0 }
 0x686   : > { %v667_v16 = vpack.c.bf16 %v665_v13, %v665_v13  ;;  %v2004_v17 = vpop.f32.mrb[7].mxu0 }
 0x688   : > { %2008 = vmatmul.mubr.msk.bf16.vlgmr.msra.gmra.mrb[16].mxu1 %vm391_vm1, %v667_v16 }
 0x689   : > { %2019 = vmatprep.mubr.msk.bf16.mxu1 %vm2429_vm0, %v2428_v0 }
 0x68b   : > { %v769_v18 = vpop.f32.mrb[8].mxu0 }
 0x68c   : > { %v2015_v19 = vpop.f32.mrb[9].mxu0  ;;  %v775_v20 = vsel %vm438_vm3, %v769_v18, -inf }
 0x68d   : > { %776 = vmax.xlane.f32.xlu0 %v775_v20  ;;  %v772_v21 = vpop.f32.mrb[10].mxu0 }
 0x68e   : > { %v2016_v22 = vpop.f32.mrb[11].mxu0 }
 0x6a3   : > { %785 = vrot.lane.b32.xlu0 %v2699_v35, %s2438_s16  ;;  %s1847_s16 = sshll.u32 %s2653_s12, 3 }
 0x6a7   : > { %890 = vrot.lane.b32.xlu0 %v2224_v6, %s2439_s9 }
 0x71a   : > { %v777_v23 = vpop.xlane.xlu0 %776 }
 0x71b   : > { %v778_v24 = vsub.f32 %v769_v18, %v777_v23 }
 0x71d   : > { %v779_v25 = vmul.f32 1.442695, %v778_v24 }
 0x71e   : > { %v786_v26 = vpop.permute.xlu0 %785 }
 0x71f   : > { %2241 = vpow2.f32 %v779_v25  ;;  %v791_v27 = vsel %vm454_vm2, %v786_v26, 0 }
 0x720   : > { %2018 = vmatpush3.bf16.msra.mxu1 %v791_v27 }
 0x721   : > { %2029 = vmatprep.subr.bf16.mxu1 %v2428_v0 }
 0x722   : > { %v891_v33 = vpop.permute.xlu0 %890 }
 0x729   : > { %v2242_v28 = vpop.eup %2241 }
 0x72a   : > { %v781_v30 = vsel %vm438_vm3, %v2242_v28, 0.0  ;;  %v784_v31 = vpack.c.bf16 %v2242_v28, %v2242_v28 }
 0x72b   : > { %782 = vadd.xlane.f32.xlu0 %v781_v30 }
 0x72c   : > { %2020 = vmatmul.mubr.msk.bf16.vlgmr.msra.gmra.mrb[20].mxu1 %vm438_vm3, %v784_v31 }
 0x72d   : > { %2030 = vmatpush3.bf16.xpose.msra.mxu1 %v898_v32  ;;  %2031 = vmatprep.mubr.msk.bf16.mxu1 %vm2429_vm0, %v2428_v0 }
 0x72e   : > { %2041 = vmatprep.subr.bf16.mxu1 %v2428_v0 }
 0x734   : > { %2032 = vmatmul.mubr.msk.bf16.vlgmr.msra.gmra.mrb[24].mxu1 %vm391_vm1, %v891_v33 }
 0x735   : > { %2043 = vmatprep.mubr.msk.bf16.mxu1 %vm2429_vm0, %v2428_v0  ;;  %2042 = vmatpush3.bf16.msra.mxu1 %v1011_v11  ;;  %v2231_v11 = vld [vmem:[#allocation9 + $0x8] ss:$0 sps:$4 sm:$0xcc]  }
 0x736   : > { %2053 = vmatprep.subr.bf16.mxu1 %v2428_v0 }
 0x741   : > { %950 = vrot.lane.b32.xlu0 %v2224_v6, %s2440_s13 }
 0x745   : > { %1059 = vrot.lane.b32.xlu0 %v2226_v34, %s2441_s29  ;;  %s1895_s29 = sshll.u32 %s2505_s22, 7 }
 0x75b   : > { %v713_v35 = vpop.f32.mrb[16].mxu1 }
 0x75c   : > { %v719_v36 = vadd.f32 %v713_v35, %v2715_v51  ;;  %v2009_v37 = vpop.f32.mrb[17].mxu1 }
 0x75d   : > { %v716_v38 = vpop.f32.mrb[18].mxu1 }
 0x75e   : > { %v2010_v39 = vpop.f32.mrb[19].mxu1 }
 0x7b8   : > { %v783_v42 = vpop.xlane.xlu0 %782 }
 0x7b9   : > { %2243 = vrcp.f32 %v783_v42  ;;  %v1171_v42 = vld [vmem:[#allocation9 + $0x8] sm:$0x3] }
 0x7bc   : > { %v951_v47 = vpop.permute.xlu0 %950 }
 0x7bd   : > { %v956_v51 = vsel %vm454_vm2, %v951_v47, 0 }
 0x7c0   : > { %v1060_v2 = vpop.permute.xlu0 %1059 }
 0x7c3   : > { %v2244_v43 = vpop.eup %2243 }
 0x7ff   : > { %v827_v44 = vpop.f32.mrb[20].mxu1 }
 0x800   : > { %v834_v45 = vmul.f32 %v2244_v43, %v827_v44  ;;  %v2021_v46 = vpop.f32.mrb[21].mxu1  ;;  %v1176_v43 = vsel %vm506_vm4, %v1171_v42, 0 }
 0x801   : > { %v830_v48 = vpop.f32.mrb[22].mxu1 }
 0x802   : > { %v836_v49 = vpack.c.bf16 %v834_v45, %v834_v45  ;;  %v2022_v50 = vpop.f32.mrb[23].mxu1 }
 0x804   : > { %2026 = vmatmul.mubr.msk.bf16.vlgmr.msra.gmra.mrb[12].mxu0 %vm391_vm1, %v836_v49 }
 0x805   : > { %2036 = vmatpush3.bf16.msra.mxu0 %v956_v51  ;;  %2037 = vmatprep.mubr.msk.bf16.mxu0 %vm2429_vm0, %v2428_v0 }
 0x806   : > { %2047 = vmatprep.subr.bf16.mxu0 %v2428_v0 }
 0x807   : > { %v934_v52 = vpop.f32.mrb[24].mxu1 }
 0x808   : > { %v2033_v53 = vpop.f32.mrb[25].mxu1  ;;  %v940_v54 = vsel %vm438_vm3, %v934_v52, -inf }
 0x809   : > { %941 = vmax.xlane.f32.xlu1 %v940_v54  ;;  %v937_v55 = vpop.f32.mrb[26].mxu1 }
 0x80a   : > { %v2034_v56 = vpop.f32.mrb[27].mxu1 }
 0x81a   : > { %1061 = vrot.lane.b32.xlu1 %v2226_v34, %s2442_s17  ;;  %s268_s17 = scalar_lea.vmem [#allocation10], %s1847_s16 }
 0x896   : > { %v942_v57 = vpop.xlane.xlu1 %941 }
 0x897   : > { %v943_v58 = vsub.f32 %v934_v52, %v942_v57 }
 0x899   : > { %v944_v59 = vmul.f32 1.442695, %v943_v58 }
 0x89a   : > { %v1062_v61 = vpop.permute.xlu1 %1061 }
 0x89b   : > { %2245 = vpow2.f32 %v944_v59  ;;  %v1067_v1 = vsel %vm391_vm1, %v1062_v61, 0 }
 0x8a5   : > { %v2246_v60 = vpop.eup %2245 }
 0x8a6   : > { %v946_v62 = vsel %vm438_vm3, %v2246_v60, 0.0  ;;  %v949_v63 = vpack.c.bf16 %v2246_v60, %v2246_v60 }
 0x8a7   : > { %947 = vadd.xlane.f32.xlu0 %v946_v62 }
 0x8a8   : > { %2038 = vmatmul.mubr.msk.bf16.vlgmr.msra.gmra.mrb[16].mxu0 %vm438_vm3, %v949_v63 }
 0x8a9   : > { %2048 = vmatpush3.bf16.xpose.msra.mxu0 %v1067_v1  ;;  %2049 = vmatprep.mubr.msk.bf16.mxu0 %vm2429_vm0, %v2428_v0 }
 0x8aa   : > { %2059 = vmatprep.subr.bf16.mxu0 %v2428_v0 }
 0x8b0   : > { %2050 = vmatmul.mubr.msk.bf16.vlgmr.msra.gmra.mrb[20].mxu0 %vm391_vm1, %v1060_v2 }
 0x8b1   : > { %2061 = vmatprep.mubr.msk.bf16.mxu0 %vm2429_vm0, %v2428_v0  ;;  %2060 = vmatpush3.bf16.msra.mxu0 %v1176_v43  ;;  %v1505_v43 = vld [vmem:[#allocation9 + $0xc] sm:$0x3] }
 0x8b2   : > { %2071 = vmatprep.subr.bf16.mxu0 %v2428_v0 }
 0x8bd   : > { %1119 = vrot.lane.b32.xlu0 %v2226_v34, %s2443_s24  ;;  %s1747_s24 = sshll.u32 %s268_s17, 4  ;;  %s2845_s24 = int_to_ptr.vmem [resolvable:$true] %s1747_s24 }
 0x8be   : > { %s2351_s22 = scalar_lea.vmem %s2845_s24, 128 }
 0x8bf   : > { %p2352_p11 = scmp.ne.s32.totalorder %s2845_s24, %s2351_s22 }
 0x8c1   : > { %1224 = vrot.lane.b32.xlu0 %v2763_v3, %s2444_s26  ;;  %p2353_p1 = pnand %p2352_p11, %p2906_p0 }
 0x8c3   : > { %p2354_p3 = pneg %p2353_p1 }
 0x8d7   : > { %v878_v4 = vpop.f32.mrb[12].mxu0 }
 0x8d8   : > { %v884_v5 = vadd.f32 %v878_v4, %v719_v36  ;;  %v2027_v6 = vpop.f32.mrb[13].mxu0  ;;  %v2229_v36 = vld [vmem:[#allocation2] ss:$0 sps:$4 sm:$0xff]  }
 0x8d9   : > { %v881_v7 = vpop.f32.mrb[14].mxu0 }
 0x8da   : > { %v2028_v8 = vpop.f32.mrb[15].mxu0 }
 0x934   : > { %v948_v12 = vpop.xlane.xlu0 %947 }
 0x935   : > { %2247 = vrcp.f32 %v948_v12  ;;  %v1340_v12 = vrot.slane %v2231_v11, 2 }
 0x938   : > { %v1120_v17 = vpop.permute.xlu0 %1119 }
 0x939   : > { %v1125_v21 = vsel %vm454_vm2, %v1120_v17, 0 }
 0x93c   : > { %v1225_v35 = vpop.permute.xlu0 %1224 }
 0x93f   : > { %v2248_v13 = vpop.eup %2247 }
 0x97b   : > { %v992_v14 = vpop.f32.mrb[16].mxu0 }
 0x97c   : > { %v999_v15 = vmul.f32 %v2248_v13, %v992_v14  ;;  %v2039_v16 = vpop.f32.mrb[17].mxu0  ;;  %v1345_v13 = vsel %vm506_vm4, %v1340_v12, 0 }
 0x97d   : > { %v995_v18 = vpop.f32.mrb[18].mxu0 }
 0x97e   : > { %v1001_v19 = vpack.c.bf16 %v999_v15, %v999_v15  ;;  %v2040_v20 = vpop.f32.mrb[19].mxu0 }
 0x980   : > { %2044 = vmatmul.mubr.msk.bf16.vlgmr.msra.gmra.mrb[28].mxu1 %vm391_vm1, %v1001_v19 }
 0x981   : > { %2054 = vmatpush3.bf16.msra.mxu1 %v1125_v21  ;;  %2055 = vmatprep.mubr.msk.bf16.mxu1 %vm2429_vm0, %v2428_v0 }
 0x982   : > { %2065 = vmatprep.subr.bf16.mxu1 %v2428_v0 }
 0x983   : > { %v1103_v22 = vpop.f32.mrb[20].mxu0 }
 0x984   : > { %v2051_v23 = vpop.f32.mrb[21].mxu0  ;;  %v1109_v24 = vsel %vm438_vm3, %v1103_v22, -inf }
 0x985   : > { %1110 = vmax.xlane.f32.xlu1 %v1109_v24  ;;  %v1106_v25 = vpop.f32.mrb[22].mxu0 }
 0x986   : > { %v2052_v26 = vpop.f32.mrb[23].mxu0 }
 0x996   : > { %1226 = vrot.lane.b32.xlu1 %v2763_v3, %s2445_s8 }
 0xa12   : > { %v1111_v27 = vpop.xlane.xlu1 %1110 }
 0xa13   : > { %v1112_v28 = vsub.f32 %v1103_v22, %v1111_v27 }
 0xa15   : > { %v1113_v29 = vmul.f32 1.442695, %v1112_v28 }
 0xa16   : > { %v1227_v31 = vpop.permute.xlu1 %1226 }
 0xa17   : > { %2249 = vpow2.f32 %v1113_v29  ;;  %v1232_v34 = vsel %vm391_vm1, %v1227_v31, 0 }
 0xa21   : > { %v2250_v30 = vpop.eup %2249 }
 0xa22   : > { %v1115_v32 = vsel %vm438_vm3, %v2250_v30, 0.0  ;;  %v1118_v33 = vpack.c.bf16 %v2250_v30, %v2250_v30 }
 0xa23   : > { %1116 = vadd.xlane.f32.xlu1 %v1115_v32 }
 0xa24   : > { %2056 = vmatmul.mubr.msk.bf16.vlgmr.msra.gmra.mrb[32].mxu1 %vm438_vm3, %v1118_v33 }
 0xa25   : > { %2066 = vmatpush3.bf16.xpose.msra.mxu1 %v1232_v34  ;;  %2067 = vmatprep.mubr.msk.bf16.mxu1 %vm2429_vm0, %v2428_v0 }
 0xa26   : > { %2077 = vmatprep.subr.bf16.mxu1 %v2428_v0 }
 0xa2c   : > { %2068 = vmatmul.mubr.msk.bf16.vlgmr.msra.gmra.mrb[36].mxu1 %vm391_vm1, %v1225_v35 }
 0xa2d   : > { %2079 = vmatprep.mubr.msk.bf16.mxu1 %vm2429_vm0, %v2428_v0  ;;  %2078 = vmatpush3.bf16.msra.mxu1 %v1345_v13 }
 0xa2e   : > { %2089 = vmatprep.subr.bf16.mxu1 %v2428_v0 }
 0xa34   : > { %1395 = vrot.lane.b32.xlu1 %v2229_v36, %s2446_s10  ;;  %s2843_s10 = scalar_lea.hbm %s2892_s5, %s1895_s29 }
 0xa38   : > { %1393 = vrot.lane.b32.xlu1 %v2229_v36, %s2447_s11  ;;  %s1734_s11 = scalar_lea.sflag [#allocation6], %s2653_s12 }
 0xa53   : > { %v1047_v37 = vpop.f32.mrb[28].mxu1 }
 0xa54   : > { %v1053_v38 = vadd.f32 %v1047_v37, %v884_v5  ;;  %v2045_v39 = vpop.f32.mrb[29].mxu1  ;;  %v2802_v5 = vld [vmem:[#allocation2] ss:$0 sps:$4 sm:$0xff]  }
 0xa55   : > { %v1050_v40 = vpop.f32.mrb[30].mxu1 }
 0xa56   : > { %v2046_v41 = vpop.f32.mrb[31].mxu1 }
 0xab0   : > { %v1117_v44 = vpop.xlane.xlu1 %1116 }
 0xab1   : > { %2251 = vrcp.f32 %v1117_v44  ;;  %v1510_v44 = vsel %vm506_vm4, %v1505_v43, 0 }
 0xab4   : > { %v1396_v63 = vpop.permute.xlu1 %1395 }
 0xab5   : > { %v1401_v4 = vsel %vm391_vm1, %v1396_v63, 0 }
 0xabb   : > { %v2252_v45 = vpop.eup %2251 }
 0xaf7   : > { %v1161_v46 = vpop.f32.mrb[32].mxu1 }
 0xaf8   : > { %v1168_v47 = vmul.f32 %v2252_v45, %v1161_v46  ;;  %v2057_v48 = vpop.f32.mrb[33].mxu1 }
 0xaf9   : > { %v1164_v49 = vpop.f32.mrb[34].mxu1 }
 0xafa   : > { %v1170_v50 = vpack.c.bf16 %v1168_v47, %v1168_v47  ;;  %v2058_v51 = vpop.f32.mrb[35].mxu1 }
 0xafc   : > { %2062 = vmatmul.mubr.msk.bf16.vlgmr.msra.gmra.mrb[24].mxu0 %vm391_vm1, %v1170_v50 }
 0xafd   : > { %2073 = vmatprep.mubr.msk.bf16.mxu0 %vm2429_vm0, %v2428_v0 }
 0xaff   : > { %v1268_v52 = vpop.f32.mrb[36].mxu1 }
 0xb00   : > { %v2069_v53 = vpop.f32.mrb[37].mxu1  ;;  %v1274_v54 = vsel %vm438_vm3, %v1268_v52, -inf }
 0xb01   : > { %1275 = vmax.xlane.f32.xlu0 %v1274_v54  ;;  %v1271_v55 = vpop.f32.mrb[38].mxu1 }
 0xb02   : > { %v2070_v56 = vpop.f32.mrb[39].mxu1 }
 0xb17   : > { %1284 = vrot.lane.b32.xlu0 %v2763_v3, %s2448_s28  ;;  %v1394_v3 = vpop.permute.xlu1 %1393  ;;  %s2453_s28 = smov [#allocation10]  }
 0xb8e   : > { %v1276_v57 = vpop.xlane.xlu0 %1275 }
 0xb8f   : > { %v1277_v58 = vsub.f32 %v1268_v52, %v1276_v57 }
 0xb91   : > { %v1278_v59 = vmul.f32 1.442695, %v1277_v58 }
 0xb92   : > { %v1285_v60 = vpop.permute.xlu0 %1284 }
 0xb93   : > { %2253 = vpow2.f32 %v1278_v59  ;;  %v1290_v61 = vsel %vm454_vm2, %v1285_v60, 0 }
 0xb94   : > { %2072 = vmatpush3.bf16.msra.mxu0 %v1290_v61 }
 0xb95   : > { %2083 = vmatprep.subr.bf16.mxu0 %v2428_v0 }
 0xb9d   : > { %v2254_v62 = vpop.eup %2253 }
 0xb9e   : > { %v1280_v1 = vsel %vm438_vm3, %v2254_v62, 0.0  ;;  %v1283_v2 = vpack.c.bf16 %v2254_v62, %v2254_v62 }
 0xb9f   : > { %1281 = vadd.xlane.f32.xlu0 %v1280_v1 }
 0xba0   : > { %2074 = vmatmul.mubr.msk.bf16.vlgmr.msra.gmra.mrb[28].mxu0 %vm438_vm3, %v1283_v2  ;;  %v2232_v2 = vld [vmem:[#allocation9 + $0xc] ss:$0 sps:$4 sm:$0xcc]  }
 0xba1   : > { %2084 = vmatpush3.bf16.xpose.msra.mxu0 %v1401_v4  ;;  %2085 = vmatprep.mubr.msk.bf16.mxu0 %vm2429_vm0, %v2428_v0  ;;  %v1674_v4 = vrot.slane %v2232_v2, 2 }
 0xba2   : > { %2095 = vmatprep.subr.bf16.mxu0 %v2428_v0 }
 0xba8   : > { %2086 = vmatmul.mubr.msk.bf16.vlgmr.msra.gmra.mrb[32].mxu0 %vm391_vm1, %v1394_v3  ;;  %v1679_v3 = vsel %vm506_vm4, %v1674_v4, 0 }
 0xba9   : > { %2097 = vmatprep.mubr.msk.bf16.mxu0 %vm2429_vm0, %v2428_v0  ;;  %2096 = vmatpush3.bf16.msra.mxu0 %v1510_v44 }
 0xbaa   : > { %2107 = vmatprep.subr.bf16.mxu0 %v2428_v0 }
 0xbb5   : > { %1453 = vrot.lane.b32.xlu0 %v2229_v36, %s2449_s7  ;;  %s2355_s7 = sshll.u32 %s2453_s28, 4  ;;  %s2356_s7 = int_to_ptr.vmem [resolvable:$false] %s2355_s7 }
 0xbb6   : > { %p2358_p7 = scmp.lt.s32.totalorder %s2845_s24, %s2356_s7 }
 0xbb9   : > { %1558 = vrot.lane.b32.xlu0 %v2802_v5, %s2450_s6  ;;  %s2357_s6 = scalar_lea.vmem %s2356_s7, 256 }
 0xbba   : > { %p2359_p9 = scmp.lt.s32.totalorder %s2357_s6, %s2351_s22 }
 0xbbc   : > { %p2360_p12 = por %p2359_p9, %p2358_p7 }
 0xbbe   : > { %p2361_p2 = pnand %p2360_p12, %p2354_p3 }
 0xbcf   : > { %v1212_v6 = vpop.f32.mrb[24].mxu0 }
 0xbd0   : > { %v1218_v7 = vadd.f32 %v1212_v6, %v1053_v38  ;;  %v2063_v8 = vpop.f32.mrb[25].mxu0 }
 0xbd1   : > { %v1215_v9 = vpop.f32.mrb[26].mxu0 }
 0xbd2   : > { %v2064_v10 = vpop.f32.mrb[27].mxu0 }
 0xc2c   : > { %v1282_v14 = vpop.xlane.xlu0 %1281 }
 0xc2d   : > { %2255 = vrcp.f32 %v1282_v14 }
 0xc30   : > { %v1454_v19 = vpop.permute.xlu0 %1453 }
 0xc31   : > { %v1459_v23 = vsel %vm454_vm2, %v1454_v19, 0  ;;  %v1893_v19 = vld [vmem:[%s2891_s4] ss:$0 sm:$0xff] }
 0xc34   : > { %v1559_v37 = vpop.permute.xlu0 %1558 }
 0xc37   : > { %v2256_v15 = vpop.eup %2255 }
 0xc73   : > { %v1326_v16 = vpop.f32.mrb[28].mxu0 }
 0xc74   : > { %v1333_v17 = vmul.f32 %v2256_v15, %v1326_v16  ;;  %v2075_v18 = vpop.f32.mrb[29].mxu0 }
 0xc75   : > { %v1329_v20 = vpop.f32.mrb[30].mxu0 }
 0xc76   : > { %v1335_v21 = vpack.c.bf16 %v1333_v17, %v1333_v17  ;;  %v2076_v22 = vpop.f32.mrb[31].mxu0 }
 0xc78   : > { %2080 = vmatmul.mubr.msk.bf16.vlgmr.msra.gmra.mrb[40].mxu1 %vm391_vm1, %v1335_v21 }
 0xc79   : > { %2090 = vmatpush3.bf16.msra.mxu1 %v1459_v23  ;;  %2091 = vmatprep.mubr.msk.bf16.mxu1 %vm2429_vm0, %v2428_v0 }
 0xc7a   : > { %2101 = vmatprep.subr.bf16.mxu1 %v2428_v0 }
 0xc7b   : > { %v1437_v24 = vpop.f32.mrb[32].mxu0 }
 0xc7c   : > { %v2087_v25 = vpop.f32.mrb[33].mxu0  ;;  %v1443_v26 = vsel %vm438_vm3, %v1437_v24, -inf }
 0xc7d   : > { %1444 = vmax.xlane.f32.xlu1 %v1443_v26  ;;  %v1440_v27 = vpop.f32.mrb[34].mxu0 }
 0xc7e   : > { %v2088_v28 = vpop.f32.mrb[35].mxu0 }
 0xc8e   : > { %1560 = vrot.lane.b32.xlu1 %v2802_v5, %s2451_s30 }
 0xd0a   : > { %v1445_v29 = vpop.xlane.xlu1 %1444 }
 0xd0b   : > { %v1446_v30 = vsub.f32 %v1437_v24, %v1445_v29 }
 0xd0d   : > { %v1447_v31 = vmul.f32 1.442695, %v1446_v30 }
 0xd0e   : > { %v1561_v33 = vpop.permute.xlu1 %1560 }
 0xd0f   : > { %2257 = vpow2.f32 %v1447_v31  ;;  %v1566_v36 = vsel %vm391_vm1, %v1561_v33, 0 }
 0xd19   : > { %v2258_v32 = vpop.eup %2257 }
 0xd1a   : > { %v1449_v34 = vsel %vm438_vm3, %v2258_v32, 0.0  ;;  %v1452_v35 = vpack.c.bf16 %v2258_v32, %v2258_v32 }
 0xd1b   : > { %1450 = vadd.xlane.f32.xlu1 %v1449_v34 }
 0xd1c   : > { %2092 = vmatmul.mubr.msk.bf16.vlgmr.msra.gmra.mrb[44].mxu1 %vm438_vm3, %v1452_v35 }
 0xd1d   : > { %2102 = vmatpush3.bf16.xpose.msra.mxu1 %v1566_v36  ;;  %2103 = vmatprep.mubr.msk.bf16.mxu1 %vm2429_vm0, %v2428_v0 }
 0xd1e   : > { %2113 = vmatprep.subr.bf16.mxu1 %v2428_v0 }
 0xd24   : > { %2104 = vmatmul.mubr.msk.bf16.vlgmr.msra.gmra.mrb[48].mxu1 %vm391_vm1, %v1559_v37 }
 0xd25   : > { %2115 = vmatprep.mubr.msk.bf16.mxu1 %vm2429_vm0, %v2428_v0  ;;  %2114 = vmatpush3.bf16.msra.mxu1 %v1679_v3 }
 0xd4b   : > { %v1381_v38 = vpop.f32.mrb[40].mxu1 }
 0xd4c   : > { %v1387_v39 = vadd.f32 %v1381_v38, %v1218_v7  ;;  %v2081_v40 = vpop.f32.mrb[41].mxu1 }
 0xd4d   : > { %v1384_v41 = vpop.f32.mrb[42].mxu1 }
 0xd4e   : > { %v2082_v42 = vpop.f32.mrb[43].mxu1 }
 0xda8   : > { %v1451_v45 = vpop.xlane.xlu1 %1450 }
 0xda9   : > { %2259 = vrcp.f32 %v1451_v45 }
 0xdb3   : > { %v2260_v46 = vpop.eup %2259 }
 0xdef   : > { %v1495_v47 = vpop.f32.mrb[44].mxu1 }
 0xdf0   : > { %v1502_v48 = vmul.f32 %v2260_v46, %v1495_v47  ;;  %v2093_v49 = vpop.f32.mrb[45].mxu1 }
 0xdf1   : > { %v1498_v50 = vpop.f32.mrb[46].mxu1 }
 0xdf2   : > { %v1504_v51 = vpack.c.bf16 %v1502_v48, %v1502_v48  ;;  %v2094_v52 = vpop.f32.mrb[47].mxu1 }
 0xdf4   : > { %2098 = vmatmul.mubr.msk.bf16.vlgmr.msra.gmra.mrb[36].mxu0 %vm391_vm1, %v1504_v51 }
 0xdf5   : > { %2109 = vmatprep.mubr.msk.bf16.mxu0 %vm2429_vm0, %v2428_v0 }
 0xdf7   : > { %v1602_v53 = vpop.f32.mrb[48].mxu1 }
 0xdf8   : > { %v2105_v54 = vpop.f32.mrb[49].mxu1  ;;  %v1608_v55 = vsel %vm438_vm3, %v1602_v53, -inf }
 0xdf9   : > { %1609 = vmax.xlane.f32.xlu0 %v1608_v55  ;;  %v1605_v56 = vpop.f32.mrb[50].mxu1 }
 0xdfa   : > { %v2106_v57 = vpop.f32.mrb[51].mxu1 }
 0xe0f   : > { %1618 = vrot.lane.b32.xlu0 %v2802_v5, %s2452_s15 }
 0xe86   : > { %v1610_v58 = vpop.xlane.xlu0 %1609 }
 0xe87   : > { %v1611_v59 = vsub.f32 %v1602_v53, %v1610_v58 }
 0xe89   : > { %v1612_v60 = vmul.f32 1.442695, %v1611_v59 }
 0xe8a   : > { %v1619_v61 = vpop.permute.xlu0 %1618 }
 0xe8b   : > { %2261 = vpow2.f32 %v1612_v60  ;;  %v1624_v62 = vsel %vm454_vm2, %v1619_v61, 0 }
 0xe8c   : > { %2108 = vmatpush3.bf16.msra.mxu0 %v1624_v62 }
 0xe95   : > { %v2262_v63 = vpop.eup %2261 }
 0xe96   : > { %v1614_v0 = vsel %vm438_vm3, %v2262_v63, 0.0  ;;  %v1617_v1 = vpack.c.bf16 %v2262_v63, %v2262_v63 }
 0xe97   : > { %1615 = vadd.xlane.f32.xlu1 %v1614_v0 }
 0xe98   : > { %2110 = vmatmul.mubr.msk.bf16.vlgmr.msra.gmra.mrb[40].mxu0 %vm438_vm3, %v1617_v1 }
 0xec7   : > { %v1546_v5 = vpop.f32.mrb[36].mxu0 }
 0xec8   : > { %v1552_v6 = vadd.f32 %v1546_v5, %v1387_v39  ;;  %v2099_v7 = vpop.f32.mrb[37].mxu0 }
 0xec9   : > { %v1549_v8 = vpop.f32.mrb[38].mxu0 }
 0xeca   : > { %v2100_v9 = vpop.f32.mrb[39].mxu0 }
 0xf24   : > { %v1616_v10 = vpop.xlane.xlu1 %1615 }
 0xf25   : > { %2263 = vrcp.f32 %v1616_v10 }
 0xf2f   : > { %v2264_v11 = vpop.eup %2263 }
 0xf6b   : > { %v1660_v12 = vpop.f32.mrb[40].mxu0 }
 0xf6c   : > { %v1667_v13 = vmul.f32 %v2264_v11, %v1660_v12  ;;  %v2111_v14 = vpop.f32.mrb[41].mxu0 }
 0xf6d   : > { %v1663_v15 = vpop.f32.mrb[42].mxu0 }
 0xf6e   : > { %v1669_v16 = vpack.c.bf16 %v1667_v13, %v1667_v13  ;;  %v2112_v17 = vpop.f32.mrb[43].mxu0 }
 0xf70   : > { %2116 = vmatmul.mubr.msk.bf16.vlgmr.msra.gmra.mrb[52].mxu1 %vm391_vm1, %v1669_v16 }
0x1043   : > { %v1715_v18 = vpop.f32.mrb[52].mxu1 }
0x1044   : > { %v1721_v20 = vadd.f32 %v1715_v18, %v1552_v6  ;;  %v2117_v21 = vpop.f32.mrb[53].mxu1 }
0x1045   : > { %v1718_v22 = vpop.f32.mrb[54].mxu1 }
0x1046   : > { %v1731_v23 = vadd.f32 %v1893_v19, %v1721_v20  ;;  %v2118_v24 = vpop.f32.mrb[55].mxu1 }
0x1048   : > { %1732 = vst [vmem:[%s268_s17] sm:$0xff] %v1731_v23 }
0x1049   : > { %2364 = shalt.err (!%p2361_p2)
}
0x104a   : > { %s2365_s12 = scalar_lea.hbm %s2843_s10, 128  ;;  %s2369_s16 = scalar_lea.hbm %s2892_s5, 256 }
0x104b   : > { %p2366_p13 = scmp.ne.s32.totalorder %s2843_s10, %s2365_s12  ;;  %p2370_p4 = scmp.lt.u32.totalorder %s2843_s10, %s2892_s5 }
0x104c   : > { %p2371_p5 = scmp.lt.u32.totalorder %s2369_s16, %s2365_s12  ;;  %p2373_p11 = scmp.lt.u32.totalorder %s2365_s12, %s2843_s10 }
0x104d   : > { %p2367_p6 = pnand %p2366_p13, %p2906_p0 }
0x104e   : > { %p2372_p8 = por %p2371_p5, %p2370_p4 }
0x104f   : > { %p2368_p10 = pneg %p2367_p6 }
0x1050   : > { %p2374_p1 = por %p2373_p11, %p2372_p8 }
0x1052   : > { %p2375_p3 = pnand %p2374_p1, %p2368_p10 }
0x1054   : > { %2378 = shalt.err (!%p2375_p3)
}
0x1055   : > { %2129 = dma.vmem_to_hbm [thread:$0]  (%p2906_p0), %s2845_s24, 128, %s2843_s10, %s1734_s11  }
0x1056 PF: > { %s1759_s29 = sand.u32 1, %s2409_s18   ;;  %p2907_p7 = scmp.ne.s32.totalorder %s2897_s25, 0 }
0x1057   : > { %p2908_p9 = scmp.ge.s32.totalorder %s2421_s21, 2  ;;  %s1760_s17 = scalar_lea.sflag [#allocation6], %s1759_s29 }
0x1059   : > { %p2143_p12 = pnand %p2908_p9, %p2907_p7 }
0x105b   : > { %2404 = dma.done.wait (!%p2143_p12), %s1760_s17, 128  }
0x105c   : > { %2406 = vsyncadd (!%p2143_p12), %s1760_s17, 4294967168  ;;  %p19_p2 = scmp.ge.s32.totalorder %s2594_s14, 4   ;;  %s2909_s18 = smov %s2413_s19 }
0x105d   : > { %s2910_s19 = smov %s2417_s20  ;;  %s2911_s20 = smov %s2610_s27 }
0x105e   : > { %s2912_s21 = smov %s2594_s14  ;;  %21 = sbr.rel (!%p19_p2) target bundleno = 6 (0x6), region = 93 }
0x1065   :  { %1765 = vsyncpa [#allocation5], 1 }
0x1066   :  { %1767 = vsyncpa [#allocation5 + $0x1], 1 }
0x1067   :  { %1768 = vsyncpa [#allocation8], 1 }
0x1068   :  { %1769 = vsyncpa [#allocation6], 1 }
0x1069   :  { %1771 = vsyncpa [#allocation6 + $0x1], 1 }

</bundles_post_ra>
